<compile_context>
chip_gen: v6e
topology: v6e:2x2x1
jax: 0.10.0
libtpu: 0.0.40
codegen_flags: <defaults>
</compile_context>

<pallas_src>
import jax
import jax.numpy as jnp
from jax.experimental import pallas as pl
from jax.experimental.pallas import tpu as pltpu


def _round_up(x, m):
    return (x + m - 1) // m * m


def _pick_b_tile(B, l_pad, l_out_pad, c_pad, k_max, f_pad, budget_bytes=12 << 20):
    """Choose a batch tile (multiple of 8) targeting a few MiB of live VMEM."""
    per_b = (2 * l_pad * c_pad * 2              # double-buffered x tile (bf16)
             + l_out_pad * k_max * c_pad * 2    # im2col operand (bf16)
             + 2 * l_out_pad * f_pad * 4        # matmul result + masked copy (f32)
             + 2 * f_pad * 4)                   # double-buffered output rows (f32)
    fixed = k_max * c_pad * f_pad * 2 + l_out_pad * f_pad * 4 + f_pad * 4
    avail = max(budget_bytes - fixed, 8 * per_b)
    bt = max(8, min(256, (avail // per_b) // 8 * 8))
    return int(min(bt, _round_up(B, 8)))


def _cnn_fused_kernel(x_ref, w_ref, b_ref, m_ref, o_ref):
    """Fused conv1d(valid) + global max-pool + bias + ReLU, all branches.

    x_ref: (bt, L_pad, Cpad)        NLC bf16 input tile (zero padded)
    w_ref: (Kmax*Cpad, Fp)          packed im2col weights, bf16, Fp % 128 == 0
    b_ref: (1, Fp)                  fused bias, f32
    m_ref: (L_out_pad, Fp)          additive validity mask (0 valid / -1e30)
    o_ref: (bt, Fp)                 pooled output, f32 (lane dense)
    """
    bt, l_pad, c_pad = x_ref.shape
    kc, f_pad = w_ref.shape
    ksz = kc // c_pad
    l_out_pad = m_ref.shape[0]

    x = x_ref[...]                                           # (bt, L_pad, Cpad) bf16
    # im2col on the narrow bf16 operand: K sublane-shifted views concatenated
    # along the lane axis -> one (bt*L_out_pad, K*Cpad) MXU operand.
    cols = [x[:, k:k + l_out_pad, :] for k in range(ksz)]    # K small & static
    x2 = jnp.concatenate(cols, axis=-1).reshape(bt * l_out_pad, kc)

    # Single MXU matmul, f32 accumulation.
    y = jnp.dot(x2, w_ref[...], preferred_element_type=jnp.float32)
    # 8-aligned epilogue: mask invalid (padded / per-branch-out-of-range) time
    # positions, one vectorized max over the time axis.
    y = y.reshape(bt, l_out_pad, f_pad) + m_ref[...][None, :, :]
    pooled = jnp.max(y, axis=1)                              # (bt, Fp)
    # Bias + ReLU hoisted after the max (ReLU monotone, bias constant in time).
    o_ref[...] = jnp.maximum(pooled + b_ref[...], 0.0).astype(o_ref.dtype)


class CNNPallas:
    """JAX/Pallas port of the PyTorch CNN module (forward only)."""

    def __init__(self, embed_dim=200, num_filters=(100, 100, 100),
                 kernel_sizes=(8, 8, 8), dropout=0.2, key=None, b_tile=None):
        self.embed_dim = embed_dim
        self.num_filters = list(num_filters)
        self.kernel_sizes = list(kernel_sizes)
        self.b_tile = b_tile
        # TODO(synk): dropout is declared in the PyTorch module but never applied
        # in forward(); kept for signature parity only.
        self.dropout = dropout
        if key is None:
            key = jax.random.PRNGKey(1)

        # Per-branch parameters in PyTorch conv1d layout (F, C, K), f32 — kept
        # for the pure-JAX reference.
        self.weights_fck = []
        self.biases = []
        for f, k in zip(self.num_filters, self.kernel_sizes):
            key, wk, bk = jax.random.split(key, 3)
            bound = 1.0 / (embed_dim * k) ** 0.5
            self.weights_fck.append(
                jax.random.uniform(wk, (f, embed_dim, k), jnp.float32,
                                   minval=-bound, maxval=bound))
            self.biases.append(
                jax.random.uniform(bk, (f,), jnp.float32,
                                   minval=-bound, maxval=bound))

        # Pack ALL branches into one im2col weight: taps zero-padded to Kmax,
        # channels padded to a 128 multiple (zeros in the contraction are free),
        # filters concatenated in branch order and padded to a 128 multiple so
        # the output store is lane dense.
        self.k_max = max(self.kernel_sizes)
        self.k_min = min(self.kernel_sizes)
        self.c_pad = _round_up(embed_dim, 128)
        self.f_total = sum(self.num_filters)
        self.f_pad = _round_up(self.f_total, 128)

        w_full = jnp.zeros((self.k_max, self.c_pad, self.f_pad), jnp.float32)
        col = 0
        for w_fck, k in zip(self.weights_fck, self.kernel_sizes):
            f = w_fck.shape[0]
            w_full = w_full.at[:k, :embed_dim, col:col + f].set(
                jnp.transpose(w_fck, (2, 1, 0)))               # (K, C, F)
            col += f
        # Row order (k, c) matches the in-kernel lane concat of the K views.
        self.w_packed = w_full.reshape(
            self.k_max * self.c_pad, self.f_pad).astype(jnp.bfloat16)

        b_full = jnp.zeros((self.f_pad,), jnp.float32)
        b_full = b_full.at[:self.f_total].set(jnp.concatenate(self.biases))
        self.b_packed = b_full.reshape(1, self.f_pad)

    def __call__(self, x_ncw):
        """x_ncw: (B, C=embed_dim, L) f32, PyTorch NCW layout.  Returns (B, sum(F))."""
        B, C, L = x_ncw.shape
        assert C == self.embed_dim, (C, self.embed_dim)
        assert L >= self.k_max, "sequence shorter than largest conv kernel"

        l_out = L - self.k_min + 1                      # positions any branch needs
        l_out_pad = _round_up(l_out, 8)                 # 8-sublane aligned epilogue
        l_pad = _round_up(max(L, l_out_pad + self.k_max - 1), 8)

        # Per-(position, filter) validity mask: branch with kernel K_i is valid
        # for t <= L - K_i; padded tail rows are invalid for every real column.
        pos = jnp.arange(l_out_pad)[:, None]
        valid = jnp.ones((l_out_pad, self.f_pad), dtype=bool)
        col = 0
        for f, k in zip(self.num_filters, self.kernel_sizes):
            valid = valid.at[:, col:col + f].set(pos <= (L - k))
            col += f
        mask = jnp.where(valid, 0.0, -1e30).astype(jnp.float32)

        bt = self.b_tile
        if bt is None:
            bt = _pick_b_tile(B, l_pad, l_out_pad, self.c_pad, self.k_max, self.f_pad)
        bt = max(8, _round_up(bt, 8))
        Bp = _round_up(B, bt)

        # NCW -> NLC (fuses into the producer under jit), zero-pad to
        # (Bp, L_pad, Cpad), bf16 MXU operand.  C last & 128-padded => the x
        # DMA and every vld are lane dense.
        x = jnp.transpose(x_ncw, (0, 2, 1))
        x = jnp.pad(x, ((0, Bp - B), (0, l_pad - L), (0, self.c_pad - C)))
        x = x.astype(jnp.bfloat16)

        out = pl.pallas_call(
            _cnn_fused_kernel,
            out_shape=jax.ShapeDtypeStruct((Bp, self.f_pad), jnp.float32),
            grid_spec=pltpu.PrefetchScalarGridSpec(
                num_scalar_prefetch=0,
                grid=(Bp // bt,),                                        # batch tiles
                in_specs=[
                    pl.BlockSpec((bt, l_pad, self.c_pad), lambda i: (i, 0, 0)),
                    pl.BlockSpec((self.k_max * self.c_pad, self.f_pad),
                                 lambda i: (0, 0)),                      # weights (resident)
                    pl.BlockSpec((1, self.f_pad), lambda i: (0, 0)),     # bias (resident)
                    pl.BlockSpec((l_out_pad, self.f_pad), lambda i: (0, 0)),  # mask
                ],
                out_specs=pl.BlockSpec((bt, self.f_pad), lambda i: (i, 0)),
            ),
            # Batch tiles are independent.  TODO(synk): on v7x use
            # pltpu.CORE_PARALLEL here to split tiles across the two TensorCores.
            compiler_params=pltpu.CompilerParams(
                dimension_semantics=("parallel",),
                vmem_limit_bytes=32 * 1024 * 1024),
        )(x, self.w_packed, self.b_packed, mask)
        return out[:B, :self.f_total]


def _reference_forward(model, x_ncw, match_bf16=False):
    """Pure-JAX reference (lax conv).  match_bf16=True rounds operands to bf16
    first so it is precision-matched to the MXU kernel."""
    def q(a):
        return a.astype(jnp.bfloat16).astype(jnp.float32) if match_bf16 else a
    x = q(x_ncw)
    outs = []
    for w_fck, b in zip(model.weights_fck, model.biases):
        y = jax.lax.conv_general_dilated(
            x, q(w_fck), window_strides=(1,), padding="VALID",
            dimension_numbers=("NCH", "OIH", "NCH"))
        y = jax.nn.relu(y + b[None, :, None])
        outs.append(jnp.max(y, axis=2))
    return jnp.concatenate(outs, axis=1)


if __name__ == "__main__":
    # Small shapes consistent with the module: batch=16, embed_dim=32,
    # seq_len=20, three conv branches.
    B, C, L = 16, 32, 20
    x = jax.random.normal(jax.random.PRNGKey(0), (B, C, L), jnp.float32)

    # --- Test 1: equal kernel sizes (the PyTorch defaults, scaled down) ------
    m1 = CNNPallas(embed_dim=C, num_filters=[16, 16, 16], kernel_sizes=[4, 4, 4],
                   key=jax.random.PRNGKey(1))
    out1 = jax.block_until_ready(jax.jit(m1.__call__)(x))
    assert out1.shape == (B, sum(m1.num_filters)), out1.shape

    ref1 = jax.block_until_ready(_reference_forward(m1, x, match_bf16=True))
    err1 = float(jnp.max(jnp.abs(out1 - ref1)))
    assert jnp.allclose(out1, ref1, atol=2e-3, rtol=2e-3), err1

    ref1_f32 = jax.block_until_ready(_reference_forward(m1, x, match_bf16=False))
    err1_f32 = float(jnp.max(jnp.abs(out1 - ref1_f32)))
    assert jnp.allclose(out1, ref1_f32, atol=1e-1, rtol=1e-1), err1_f32

    # --- Test 2: heterogeneous kernel sizes exercise the Kmax-padded path ----
    m2 = CNNPallas(embed_dim=C, num_filters=[16, 8, 16], kernel_sizes=[3, 4, 5],
                   key=jax.random.PRNGKey(2))
    out2 = jax.block_until_ready(jax.jit(m2.__call__)(x))
    assert out2.shape == (B, sum(m2.num_filters)), out2.shape

    ref2 = jax.block_until_ready(_reference_forward(m2, x, match_bf16=True))
    err2 = float(jnp.max(jnp.abs(out2 - ref2)))
    assert jnp.allclose(out2, ref2, atol=2e-3, rtol=2e-3), err2

    print("KERNEL_OK")
</pallas_src>

<mosaic_0001>
module attributes {stable_mosaic.version = 11 : i64} {
  func.func @_cnn_fused_kernel(%arg0: i32, %arg1: memref<16x32x128xbf16, #tpu.memory_space<vmem>>, %arg2: memref<512x128xbf16, #tpu.memory_space<vmem>>, %arg3: memref<1x128xf32, #tpu.memory_space<vmem>>, %arg4: memref<24x128xf32, #tpu.memory_space<vmem>>, %arg5: memref<16x128xf32, #tpu.memory_space<vmem>>) attributes {dimension_semantics = [#tpu.dimension_semantics<parallel>], iteration_bounds = array<i64: 1>, scalar_prefetch = 0 : i64, scratch_operands = 0 : i64, tpu.core_type = #tpu.core_type<tc>, window_params = [{transform_indices = @transform_0, window_bounds = array<i64: 16, 32, 128>}, {pipeline_mode = #tpu.pipeline_mode<synchronous>, transform_indices = @transform_1, window_bounds = array<i64: 512, 128>}, {pipeline_mode = #tpu.pipeline_mode<synchronous>, transform_indices = @transform_2, window_bounds = array<i64: 1, 128>}, {pipeline_mode = #tpu.pipeline_mode<synchronous>, transform_indices = @transform_3, window_bounds = array<i64: 24, 128>}, {transform_indices = @transform_4, window_bounds = array<i64: 16, 128>}]} {
    %c0 = arith.constant 0 : index
    %c0_0 = arith.constant 0 : index
    %c0_1 = arith.constant 0 : index
    %0 = vector.load %arg1[%c0, %c0_0, %c0_1] : memref<16x32x128xbf16, #tpu.memory_space<vmem>>, vector<16x32x128xbf16>
    %1 = vector.extract_strided_slice %0 {offsets = [0, 0, 0], sizes = [16, 24, 128], strides = [1, 1, 1]} : vector<16x32x128xbf16> to vector<16x24x128xbf16>
    %2 = vector.extract_strided_slice %0 {offsets = [0, 1, 0], sizes = [16, 24, 128], strides = [1, 1, 1]} : vector<16x32x128xbf16> to vector<16x24x128xbf16>
    %3 = vector.extract_strided_slice %0 {offsets = [0, 2, 0], sizes = [16, 24, 128], strides = [1, 1, 1]} : vector<16x32x128xbf16> to vector<16x24x128xbf16>
    %4 = vector.extract_strided_slice %0 {offsets = [0, 3, 0], sizes = [16, 24, 128], strides = [1, 1, 1]} : vector<16x32x128xbf16> to vector<16x24x128xbf16>
    %5 = tpu.concatenate %1, %2, %3, %4 in 2 : vector<16x24x128xbf16>, vector<16x24x128xbf16>, vector<16x24x128xbf16>, vector<16x24x128xbf16> -> vector<16x24x512xbf16>
    %6 = vector.shape_cast %5 : vector<16x24x512xbf16> to vector<384x512xbf16>
    %c0_2 = arith.constant 0 : index
    %c0_3 = arith.constant 0 : index
    %7 = vector.load %arg2[%c0_2, %c0_3] : memref<512x128xbf16, #tpu.memory_space<vmem>>, vector<512x128xbf16>
    %cst = arith.constant dense<0.000000e+00> : vector<384x128xf32>
    %8 = tpu.matmul %6, %7, %cst {dimension_numbers = #tpu.dot_dimension_numbers<[1], [0], [0], [1], [0, 0, 1, 1], [], []>} : vector<384x512xbf16>, vector<512x128xbf16>, vector<384x128xf32> -> vector<384x128xf32>
    %9 = vector.shape_cast %8 : vector<384x128xf32> to vector<16x24x128xf32>
    %c0_4 = arith.constant 0 : index
    %c0_5 = arith.constant 0 : index
    %10 = vector.load %arg4[%c0_4, %c0_5] : memref<24x128xf32, #tpu.memory_space<vmem>>, vector<24x128xf32>
    %11 = vector.shape_cast %10 : vector<24x128xf32> to vector<1x24x128xf32>
    %12 = vector.broadcast %11 : vector<1x24x128xf32> to vector<16x24x128xf32>
    %13 = arith.addf %9, %12 : vector<16x24x128xf32>
    %cst_6 = arith.constant dense<0xFF800000> : vector<16x128xf32>
    %14 = vector.multi_reduction <maximumf>, %13, %cst_6 [1] : vector<16x24x128xf32> to vector<16x128xf32>
    %c0_7 = arith.constant 0 : index
    %c0_8 = arith.constant 0 : index
    %15 = vector.load %arg3[%c0_7, %c0_8] : memref<1x128xf32, #tpu.memory_space<vmem>>, vector<1x128xf32>
    %16 = vector.broadcast %15 : vector<1x128xf32> to vector<16x128xf32>
    %17 = arith.addf %14, %16 : vector<16x128xf32>
    %cst_9 = arith.constant 0.000000e+00 : f32
    %18 = vector.broadcast %cst_9 : f32 to vector<16x128xf32>
    %19 = arith.maximumf %17, %18 : vector<16x128xf32>
    %c0_10 = arith.constant 0 : index
    %c0_11 = arith.constant 0 : index
    %20 = vector.load %arg5[%c0_10, %c0_11] : memref<16x128xf32, #tpu.memory_space<vmem>>, vector<16x128xf32>
    tpu.vector_store %arg5[%c0_10, %c0_11], %19 {strides = array<i32>} : memref<16x128xf32, #tpu.memory_space<vmem>>, vector<16x128xf32>,
    return
  }
  func.func @transform_0(%arg0: i32) -> (i32, i32, i32) {
    %c0_i32 = arith.constant 0 : i32
    %c0_i32_0 = arith.constant 0 : i32
    %c0_i32_1 = arith.constant 0 : i32
    return %arg0, %c0_i32, %c0_i32_0 : i32, i32, i32
  }
  func.func @transform_1(%arg0: i32) -> (i32, i32) {
    %c0_i32 = arith.constant 0 : i32
    %c0_i32_0 = arith.constant 0 : i32
    %c0_i32_1 = arith.constant 0 : i32
    return %c0_i32, %c0_i32_0 : i32, i32
  }
  func.func @transform_2(%arg0: i32) -> (i32, i32) {
    %c0_i32 = arith.constant 0 : i32
    %c0_i32_0 = arith.constant 0 : i32
    %c0_i32_1 = arith.constant 0 : i32
    return %c0_i32, %c0_i32_0 : i32, i32
  }
  func.func @transform_3(%arg0: i32) -> (i32, i32) {
    %c0_i32 = arith.constant 0 : i32
    %c0_i32_0 = arith.constant 0 : i32
    %c0_i32_1 = arith.constant 0 : i32
    return %c0_i32, %c0_i32_0 : i32, i32
  }
  func.func @transform_4(%arg0: i32) -> (i32, i32) {
    %c0_i32 = arith.constant 0 : i32
    %c0_i32_0 = arith.constant 0 : i32
    return %arg0, %c0_i32 : i32, i32
  }
}

</mosaic_0001>

<bundles_post_ra>
// kernel: a_call__.1
= control target key start
LH: loop header
LB: loop body
LE: loop exit
PB: predicated region body
PF: predicated region fallthrough
CT: control target
= control target key end

     0   :  { %v2180_v1 = vmov 0   ;;  %vm243_vm0 = vsmask.f32 7424  ;;  %vm533_vm1 = vsmask.f32 6400  ;;  %vm484_vm2 = vcmask 1046528   ;;  %s2933_s0 = inlined_call_operand.vmem [shape: bf16[16,32,128], index: 0, kind: input, shape index: {}]   ;;  %s2934_s1 = inlined_call_operand.vmem [shape: bf16[512,128], index: 1, kind: input, shape index: {}]   ;;  %s2935_s2 = inlined_call_operand.vmem [shape: f32[1,128], index: 2, kind: input, shape index: {}]   ;;  %s2936_s3 = inlined_call_operand.vmem [shape: f32[24,128], index: 3, kind: input, shape index: {}]   ;;  %s2937_s4 = inlined_call_operand.hbm [shape: f32[16,128], index: 4, kind: output, shape index: {}]  }
   0x1   :  { %v2078_v0 = vld [vmem:[%s2934_s1 + $0x38] sm:$0xff]   ;;  %1230 = vmatprep.subr.bf16.mxu0 %v2180_v1  ;;  %1455 = vmatprep.subr.bf16.mxu1 %v2180_v1  ;;  %v2080_v3 = vld [vmem:[%s2934_s1 + $0x30] sm:$0xff]   ;;  %v2082_v5 = vld [vmem:[%s2934_s1 + $0x28] sm:$0xff]  }
   0x2   :  { %v2079_v2 = vld [vmem:[%s2934_s1 + $0xb8] sm:$0xff]   ;;  %1231 = vmatpush1.bf16.msra.mxu0 %v2078_v0  ;;  %v2081_v4 = vld [vmem:[%s2934_s1 + $0xb0] sm:$0xff]   ;;  %v2083_v6 = vld [vmem:[%s2934_s1 + $0xa8] sm:$0xff]  }
   0x3   :  { %1456 = vmatpush1.bf16.msra.mxu1 %v2079_v2  ;;  %1232 = vmatprep.subr.bf16.mxu0 %v2180_v1  ;;  %v2084_v7 = vld [vmem:[%s2934_s1 + $0x20] sm:$0xff]   ;;  %v2086_v9 = vld [vmem:[%s2934_s1 + $0x18] sm:$0xff]   ;;  %v2088_v11 = vld [vmem:[%s2934_s1 + $0x10] sm:$0xff]  }
   0x4   :  { %1457 = vmatprep.subr.bf16.mxu1 %v2180_v1  ;;  %v2085_v8 = vld [vmem:[%s2934_s1 + $0xa0] sm:$0xff]   ;;  %v2087_v10 = vld [vmem:[%s2934_s1 + $0x98] sm:$0xff]   ;;  %v2089_v12 = vld [vmem:[%s2934_s1 + $0x90] sm:$0xff]  }
   0x5   :  { %v2090_v13 = vld [vmem:[%s2934_s1 + $0x8] sm:$0xff]   ;;  %v2092_v15 = vld [vmem:[%s2934_s1] sm:$0xff]   ;;  %v2094_v17 = vld [vmem:[%s2934_s1 + $0x78] sm:$0xff]  }
   0x6   :  { %1233 = vmatpush1.bf16.msra.mxu0 %v2080_v3  ;;  %v2091_v14 = vld [vmem:[%s2934_s1 + $0x88] sm:$0xff]   ;;  %v2093_v16 = vld [vmem:[%s2934_s1 + $0x80] sm:$0xff]   ;;  %v2095_v18 = vld [vmem:[%s2934_s1 + $0xf8] sm:$0xff]  }
   0x7   :  { %1458 = vmatpush1.bf16.msra.mxu1 %v2081_v4  ;;  %1234 = vmatprep.subr.bf16.mxu0 %v2180_v1  ;;  %v2284_v19 = vld [vmem:[%s2933_s0 + $0x8] sm:$0xf]  ;;  %v22_v20 = vld [vmem:[%s2933_s0 + $0xc] sm:$0xf]  ;;  %v2292_v21 = vld [vmem:[%s2933_s0] sm:$0xff]  }
   0x8   :  { %1459 = vmatprep.subr.bf16.mxu1 %v2180_v1  ;;  %v2096_v22 = vld [vmem:[%s2934_s1 + $0x70] sm:$0xff]   ;;  %v2298_v23 = vcombine.low %v2284_v19, %v22_v20  ;;  %v245_v25 = vshrl.u32 %v2292_v21, 16  ;;  %v247_v26 = vshll.u32 %v2292_v21, 16  ;;  %v2098_v32 = vld [vmem:[%s2934_s1 + $0x68] sm:$0xff]   ;;  %v2338_v43 = vld [vmem:[%s2933_s0 + $0x18] sm:$0xf] }
   0x9   :  { %v2097_v24 = vld [vmem:[%s2934_s1 + $0xf0] sm:$0xff]   ;;  %v2099_v36 = vld [vmem:[%s2934_s1 + $0xe8] sm:$0xff]   ;;  %v26_v44 = vld [vmem:[%s2933_s0 + $0x1c] sm:$0xf] }
   0xa   :  { %1235 = vmatpush1.bf16.msra.mxu0 %v2082_v5  ;;  %v252_v27 = vshll.u32 %v2298_v23, 16  ;;  %v256_v28 = vshrl.u32 %v2298_v23, 16  ;;  %v249_v29 = vrot.slane %v247_v26, 1  ;;  %v534_v30 = vrot.slane %v245_v25, 1  ;;  %v2326_v40 = vld [vmem:[%s2933_s0 + $0x10] sm:$0xf] }
   0xb   :  { %1460 = vmatpush1.bf16.msra.mxu1 %v2083_v6  ;;  %1236 = vmatprep.subr.bf16.mxu0 %v2180_v1  ;;  %v535_v31 = vrot.slane %v247_v26, 2  ;;  %v2331_v41 = vld [vmem:[%s2933_s0 + $0x14] sm:$0xf]  ;;  %v2100_v45 = vld [vmem:[%s2934_s1 + $0x60] sm:$0xff]   ;;  %v2358_v49 = vcombine.low %v2338_v43, %v26_v44  ;;  %v2102_v50 = vld [vmem:[%s2934_s1 + $0x58] sm:$0xff]  }
   0xc   :  { %1461 = vmatprep.subr.bf16.mxu1 %v2180_v1  ;;  %v2312_v33 = vrot.slane %v252_v27, 1  ;;  %v537_v34 = vrot.slane %v256_v28, 1  ;;  %v538_v35 = vrot.slane %v252_v27, 2  ;;  %v250_v37 = vor.u32 %v249_v29, %v245_v25  ;;  %v2101_v47 = vld [vmem:[%s2934_s1 + $0xe0] sm:$0xff]   ;;  %v2103_v51 = vld [vmem:[%s2934_s1 + $0xd8] sm:$0xff]   ;;  %v2104_v56 = vld [vmem:[%s2934_s1 + $0x50] sm:$0xff]  }
   0xd   :  { %v536_v38 = vor.u32 %v535_v31, %v534_v30  ;;  %v2354_v48 = vcombine.low %v2326_v40, %v2331_v41  ;;  %v267_v54 = vshll.u32 %v2358_v49, 16  ;;  %v271_v55 = vshrl.u32 %v2358_v49, 16  ;;  %v2105_v57 = vld [vmem:[%s2934_s1 + $0xd0] sm:$0xff]   ;;  %v2106_v63 = vld [vmem:[%s2934_s1 + $0x48] sm:$0xff]   ;;  %v2108_v6 = vld [vmem:[%s2934_s1 + $0x40] sm:$0xff]  }
   0xe   :  { %1237 = vmatpush1.bf16.msra.mxu0 %v2084_v7  ;;  %v2321_v39 = vor.u32 %v538_v35, %v537_v34  ;;  %v255_v42 = vsel %vm243_vm0, %v250_v37, %v2312_v33  ;;  %v2107_v0 = vld [vmem:[%s2934_s1 + $0xc8] sm:$0xff]   ;;  %v2109_v7 = vld [vmem:[%s2934_s1 + $0xc0] sm:$0xff]  }
   0xf   :  { %1462 = vmatpush1.bf16.msra.mxu1 %v2085_v8  ;;  %1238 = vmatprep.subr.bf16.mxu0 %v2180_v1  ;;  %v262_v52 = vshll.u32 %v2354_v48, 16  ;;  %v260_v53 = vshrl.u32 %v2354_v48, 16  ;;  %v544_v61 = vrot.slane %v271_v55, 1  ;;  %v545_v62 = vrot.slane %v267_v54, 2 }
  0x10   :  { %1463 = vmatprep.subr.bf16.mxu1 %v2180_v1  ;;  %1262 = vmatprep.mubr.bf16.mxu0 %v255_v42  ;;  %v540_v46 = vsel %vm533_vm1, %v536_v38, %v2321_v39  ;;  %v269_v3 = vrot.slane %v267_v54, 1  ;;  %v485_v8 = vrot.slane %v2292_v21, 1 }
  0x11   :  { %1487 = vmatprep.mubr.bf16.mxu1 %v540_v46  ;;  %v264_v58 = vrot.slane %v262_v52, 1  ;;  %v541_v59 = vrot.slane %v260_v53, 1  ;;  %v542_v60 = vrot.slane %v262_v52, 2  ;;  %v546_v5 = vor.u32 %v545_v62, %v544_v61 }
  0x12   :  { %1239 = vmatpush1.bf16.msra.mxu0 %v2086_v9  ;;  %v486_v9 = vrot.slane %v2298_v23, 1 }
  0x13   :  { %1464 = vmatpush1.bf16.msra.mxu1 %v2087_v10  ;;  %1240 = vmatprep.subr.bf16.mxu0 %v2180_v1  ;;  %v265_v2 = vor.u32 %v264_v58, %v260_v53  ;;  %v543_v4 = vor.u32 %v542_v60, %v541_v59  ;;  %v258_v10 = vor.u32 %v256_v28, %v2312_v33 }
  0x14   :  { %1465 = vmatprep.subr.bf16.mxu1 %v2180_v1 }
  0x16   :  { %1241 = vmatpush1.bf16.msra.mxu0 %v2088_v11  ;;  %v270_v11 = vsel %vm243_vm0, %v265_v2, %v269_v3 }
  0x17   :  { %1466 = vmatpush1.bf16.msra.mxu1 %v2089_v12  ;;  %1242 = vmatprep.subr.bf16.mxu0 %v2180_v1  ;;  %v2404_v12 = vld [vmem:[%s2933_s0 + $0x28] sm:$0xf] }
  0x18   :  { %1467 = vmatprep.subr.bf16.mxu1 %v2180_v1 }
  0x1a   :  { %1243 = vmatpush1.bf16.msra.mxu0 %v2090_v13  ;;  %v30_v13 = vld [vmem:[%s2933_s0 + $0x2c] sm:$0xf] }
  0x1b   :  { %1468 = vmatpush1.bf16.msra.mxu1 %v2091_v14  ;;  %1244 = vmatprep.subr.bf16.mxu0 %v2180_v1  ;;  %v547_v14 = vsel %vm533_vm1, %v543_v4, %v546_v5 }
  0x1c   :  { %1469 = vmatprep.subr.bf16.mxu1 %v2180_v1 }
  0x1e   :  { %1245 = vmatpush1.bf16.msra.mxu0 %v2092_v15  ;;  %v488_v15 = vrot.slane %v2354_v48, 1 }
  0x1f   :  { %1470 = vmatpush1.bf16.msra.mxu1 %v2093_v16  ;;  %1246 = vmatprep.subr.bf16.mxu0 %v2180_v1  ;;  %v489_v16 = vrot.slane %v2358_v49, 1 }
  0x20   :  { %1471 = vmatprep.subr.bf16.mxu1 %v2180_v1 }
  0x22   :  { %1247 = vmatpush2.bf16.msra.mxu0 %v2094_v17  ;;  %v2416_v17 = vld [vmem:[%s2933_s0 + $0x20] sm:$0xff]  }
  0x23   :  { %1472 = vmatpush2.bf16.msra.mxu1 %v2095_v18  ;;  %1248 = vmatprep.subr.bf16.mxu0 %v2180_v1 }
  0x24   :  { %1473 = vmatprep.subr.bf16.mxu1 %v2180_v1 }
  0x26   :  { %1249 = vmatpush2.bf16.msra.mxu0 %v2096_v22 }
  0x27   :  { %1474 = vmatpush2.bf16.msra.mxu1 %v2097_v24  ;;  %1250 = vmatprep.subr.bf16.mxu0 %v2180_v1 }
  0x28   :  { %1475 = vmatprep.subr.bf16.mxu1 %v2180_v1 }
  0x2a   :  { %1251 = vmatpush2.bf16.msra.mxu0 %v2098_v32 }
  0x2b   :  { %1476 = vmatpush2.bf16.msra.mxu1 %v2099_v36  ;;  %1252 = vmatprep.subr.bf16.mxu0 %v2180_v1 }
  0x2c   :  { %1477 = vmatprep.subr.bf16.mxu1 %v2180_v1 }
  0x2e   :  { %1253 = vmatpush2.bf16.msra.mxu0 %v2100_v45 }
  0x2f   :  { %1478 = vmatpush2.bf16.msra.mxu1 %v2101_v47  ;;  %1254 = vmatprep.subr.bf16.mxu0 %v2180_v1 }
  0x30   :  { %1479 = vmatprep.subr.bf16.mxu1 %v2180_v1 }
  0x32   :  { %1255 = vmatpush2.bf16.msra.mxu0 %v2102_v50 }
  0x33   :  { %1480 = vmatpush2.bf16.msra.mxu1 %v2103_v51  ;;  %1256 = vmatprep.subr.bf16.mxu0 %v2180_v1 }
  0x34   :  { %1481 = vmatprep.subr.bf16.mxu1 %v2180_v1 }
  0x36   :  { %1257 = vmatpush2.bf16.msra.mxu0 %v2104_v56 }
  0x37   :  { %1482 = vmatpush2.bf16.msra.mxu1 %v2105_v57  ;;  %1258 = vmatprep.subr.bf16.mxu0 %v2180_v1 }
  0x38   :  { %1483 = vmatprep.subr.bf16.mxu1 %v2180_v1 }
  0x3a   :  { %1259 = vmatpush2.bf16.msra.mxu0 %v2106_v63 }
  0x3b   :  { %1484 = vmatpush2.bf16.msra.mxu1 %v2107_v0  ;;  %1260 = vmatprep.subr.bf16.mxu0 %v2180_v1 }
  0x3c   :  { %1485 = vmatprep.subr.bf16.mxu1 %v2180_v1 }
  0x3d   :  { %9 = vsyncpa [#allocation3], 0  ;;  %v2002_v18 = vcombine.low %v258_v10, %v270_v11  ;;  %v273_v20 = vor.u32 %v271_v55, %v269_v3  ;;  %v487_v22 = vsel %vm484_vm2, %v485_v8, %v486_v9  ;;  %v2004_v1 = vcombine.low %v2321_v39, %v547_v14  ;;  %v2426_v24 = vld [vmem:[%s2933_s0 + $0x30] sm:$0xf]  ;;  %v2431_v25 = vld [vmem:[%s2933_s0 + $0x34] sm:$0xf] }
  0x3e   :  { %1261 = vmatpush2.bf16.msra.mxu0 %v2108_v6  ;;  %v2421_v23 = vcombine.low %v2404_v12, %v30_v13  ;;  %v490_v26 = vsel %vm484_vm2, %v488_v15, %v489_v16  ;;  %v658_v27 = vunpack.c.h.b16 %v270_v11  ;;  %v275_v28 = vshrl.u32 %v2416_v17, 16  ;;  %v2439_v29 = vld [vmem:[%s2933_s0 + $0x38] sm:$0xf]  ;;  %v34_v30 = vld [vmem:[%s2933_s0 + $0x3c] sm:$0xf] }
  0x3f   :  { %1486 = vmatpush2.bf16.msra.mxu1 %v2109_v7  ;;  %v661_v31 = vunpack.c.l.b16 %v273_v20  ;;  %v660_v32 = vunpack.c.h.b16 %v547_v14  ;;  %v663_v33 = vunpack.c.l.b16 %v546_v5  ;;  %v1975_v36 = vcombine.low %v2426_v24, %v2431_v25  ;;  %v2467_v11 = vld [vmem:[%s2933_s0 + $0x48] sm:$0xf]  ;;  %v38_v13 = vld [vmem:[%s2933_s0 + $0x4c] sm:$0xf] }
  0x40   :  { %v282_v34 = vshll.u32 %v2421_v23, 16  ;;  %v286_v35 = vshrl.u32 %v2421_v23, 16  ;;  %v2450_v37 = vcombine.low %v2439_v29, %v34_v30  ;;  %v2001_v38 = vcombine.low %v2284_v19, %v2326_v40 }
  0x41   :  { %1263 = vmatmul.mubr.bf16.vlgmr.msra.gmra.mxu0 %v2292_v21  ;;  %v277_v21 = vshll.u32 %v2416_v17, 16  ;;  %v2003_v39 = vcombine.low %v486_v9, %v490_v26  ;;  %v862_v42 = vpack.c.b16 %v661_v31, %v658_v27  ;;  %v864_v44 = vpack.c.b16 %v663_v33, %v660_v32  ;;  %v2490_v27 = vld [vmem:[%s2933_s0 + $0x54] sm:$0xf]  ;;  %v2499_v32 = vld [vmem:[%s2933_s0 + $0x58] sm:$0xf] }
  0x42   :  { %1488 = vmatmul.mubr.bf16.vlgmr.msra.gmra.mxu1 %v487_v22  ;;  %1270 = vmatprep.mubr.bf16.mxu0 %v2002_v18  ;;  %v548_v46 = vrot.slane %v275_v28, 1  ;;  %v551_v48 = vrot.slane %v286_v35, 1  ;;  %v552_v49 = vrot.slane %v282_v34, 2  ;;  %v292_v50 = vshll.u32 %v1975_v36, 16  ;;  %v42_v33 = vld [vmem:[%s2933_s0 + $0x5c] sm:$0xf] }
  0x43   :  { %1495 = vmatprep.mubr.bf16.mxu1 %v2004_v1  ;;  %v279_v45 = vrot.slane %v277_v21, 1  ;;  %v549_v47 = vrot.slane %v277_v21, 2  ;;  %v290_v51 = vshrl.u32 %v1975_v36, 16  ;;  %v297_v52 = vshll.u32 %v2450_v37, 16 }
  0x44   :  { %v301_v53 = vshrl.u32 %v2450_v37, 16  ;;  %v659_v54 = vunpack.c.h.b16 %v490_v26  ;;  %v662_v55 = vunpack.c.l.b16 %v489_v16  ;;  %v284_v19 = vrot.slane %v282_v34, 1  ;;  %v2476_v16 = vld [vmem:[%s2933_s0 + $0x40] sm:$0xff]   ;;  %v2485_v26 = vld [vmem:[%s2933_s0 + $0x50] sm:$0xf] }
  0x45   :  { %v280_v40 = vor.u32 %v279_v45, %v275_v28  ;;  %v550_v56 = vor.u32 %v549_v47, %v548_v46  ;;  %v553_v57 = vor.u32 %v552_v49, %v551_v48  ;;  %v294_v58 = vrot.slane %v292_v50, 1 }
  0x46   :  { %v555_v59 = vrot.slane %v290_v51, 1  ;;  %v556_v60 = vrot.slane %v292_v50, 2  ;;  %v558_v61 = vrot.slane %v301_v53, 1  ;;  %v559_v62 = vrot.slane %v297_v52, 2 }
  0x47   :  { %v2005_v63 = vcombine.low %v2331_v41, %v2338_v43  ;;  %v863_v0 = vpack.c.b16 %v662_v55, %v659_v54  ;;  %v285_v2 = vsel %vm243_vm0, %v280_v40, %v284_v19  ;;  %v295_v3 = vor.u32 %v294_v58, %v290_v51 }
  0x48   :  { %v299_v4 = vrot.slane %v297_v52, 1  ;;  %v554_v5 = vsel %vm533_vm1, %v550_v56, %v553_v57  ;;  %v557_v6 = vor.u32 %v556_v60, %v555_v59  ;;  %v560_v7 = vor.u32 %v559_v62, %v558_v61 }
  0x49   :  { %1271 = vmatmul.mubr.bf16.gmra.mxu0 %v2001_v38  ;;  %v288_v8 = vor.u32 %v286_v35, %v284_v19  ;;  %v491_v9 = vrot.slane %v2416_v17, 1  ;;  %v492_v10 = vrot.slane %v2421_v23, 1  ;;  %v494_v14 = vrot.slane %v1975_v36, 1 }
  0x4a   :  { %1496 = vmatmul.mubr.bf16.gmra.mxu1 %v2003_v39  ;;  %1278 = vmatprep.mubr.bf16.mxu0 %v862_v42  ;;  %v300_v41 = vsel %vm243_vm0, %v295_v3, %v299_v4  ;;  %v561_v43 = vsel %vm533_vm1, %v557_v6, %v560_v7  ;;  %v495_v15 = vrot.slane %v2450_v37, 1  ;;  %v303_v20 = vor.u32 %v301_v53, %v299_v4 }
  0x4b   :  { %1503 = vmatprep.mubr.bf16.mxu1 %v864_v44  ;;  %v2007_v18 = vcombine.low %v288_v8, %v300_v41  ;;  %v493_v22 = vsel %vm484_vm2, %v491_v9, %v492_v10  ;;  %v2009_v1 = vcombine.low %v553_v57, %v561_v43  ;;  %v2480_v23 = vcombine.low %v2467_v11, %v38_v13 }
  0x4c   :  { %v496_v28 = vsel %vm484_vm2, %v494_v14, %v495_v15  ;;  %v305_v30 = vshrl.u32 %v2476_v16, 16  ;;  %v307_v31 = vshll.u32 %v2476_v16, 16  ;;  %v676_v21 = vunpack.c.h.b16 %v300_v41  ;;  %v2526_v41 = vld [vmem:[%s2933_s0 + $0x68] sm:$0xf] }
  0x4d   :  { %v679_v34 = vunpack.c.l.b16 %v303_v20  ;;  %v681_v35 = vunpack.c.l.b16 %v560_v7  ;;  %v312_v36 = vshll.u32 %v2480_v23, 16  ;;  %v316_v37 = vshrl.u32 %v2480_v23, 16 }
  0x4e   :  { %v1979_v38 = vcombine.low %v2485_v26, %v2490_v27  ;;  %v2509_v39 = vcombine.low %v2499_v32, %v42_v33  ;;  %v2006_v42 = vcombine.low %v2404_v12, %v2426_v24  ;;  %v2008_v44 = vcombine.low %v492_v10, %v496_v28 }
  0x4f   :  { %v873_v45 = vpack.c.b16 %v679_v34, %v676_v21  ;;  %v309_v47 = vrot.slane %v307_v31, 1  ;;  %v562_v48 = vrot.slane %v305_v30, 1  ;;  %v563_v49 = vrot.slane %v307_v31, 2  ;;  %v2557_v21 = vld [vmem:[%s2933_s0 + $0x78] sm:$0xf] }
  0x50   :  { %v565_v50 = vrot.slane %v316_v37, 1  ;;  %v566_v51 = vrot.slane %v312_v36, 2  ;;  %v322_v52 = vshll.u32 %v1979_v38, 16  ;;  %v320_v53 = vshrl.u32 %v1979_v38, 16  ;;  %v50_v34 = vld [vmem:[%s2933_s0 + $0x7c] sm:$0xf] }
  0x51   :  { %1279 = vmatmul.mubr.bf16.gmra.mxu0 %v2005_v63  ;;  %v327_v54 = vshll.u32 %v2509_v39, 16  ;;  %v331_v55 = vshrl.u32 %v2509_v39, 16  ;;  %v677_v19 = vunpack.c.h.b16 %v496_v28  ;;  %v680_v40 = vunpack.c.l.b16 %v495_v15  ;;  %v2535_v15 = vld [vmem:[%s2933_s0 + $0x60] sm:$0xff]   ;;  %v2544_v28 = vld [vmem:[%s2933_s0 + $0x70] sm:$0xf] }
  0x52   :  { %1504 = vmatmul.mubr.bf16.gmra.mxu1 %v863_v0  ;;  %1286 = vmatprep.mubr.bf16.mxu0 %v285_v2  ;;  %v310_v12 = vor.u32 %v309_v47, %v305_v30  ;;  %v314_v24 = vrot.slane %v312_v36, 1  ;;  %v564_v56 = vor.u32 %v563_v49, %v562_v48  ;;  %v567_v57 = vor.u32 %v566_v51, %v565_v50  ;;  %v2549_v30 = vld [vmem:[%s2933_s0 + $0x74] sm:$0xf] }
  0x53   :  { %1511 = vmatprep.mubr.bf16.mxu1 %v554_v5  ;;  %v324_v58 = vrot.slane %v322_v52, 1  ;;  %v569_v59 = vrot.slane %v320_v53, 1  ;;  %v570_v60 = vrot.slane %v322_v52, 2  ;;  %v572_v61 = vrot.slane %v331_v55, 1 }
  0x54   :  { %v573_v62 = vrot.slane %v327_v54, 2  ;;  %v2010_v63 = vcombine.low %v2431_v25, %v2439_v29  ;;  %v874_v0 = vpack.c.b16 %v680_v40, %v677_v19  ;;  %v315_v2 = vsel %vm243_vm0, %v310_v12, %v314_v24 }
  0x55   :  { %v325_v3 = vor.u32 %v324_v58, %v320_v53  ;;  %v329_v4 = vrot.slane %v327_v54, 1  ;;  %v568_v5 = vsel %vm533_vm1, %v564_v56, %v567_v57  ;;  %v571_v6 = vor.u32 %v570_v60, %v569_v59 }
  0x56   :  { %v574_v7 = vor.u32 %v573_v62, %v572_v61  ;;  %v318_v8 = vor.u32 %v316_v37, %v314_v24  ;;  %v497_v9 = vrot.slane %v2476_v16, 1  ;;  %v498_v10 = vrot.slane %v2480_v23, 1 }
  0x57   :  { %v330_v25 = vsel %vm243_vm0, %v325_v3, %v329_v4  ;;  %v500_v13 = vrot.slane %v1979_v38, 1  ;;  %v501_v14 = vrot.slane %v2509_v39, 1  ;;  %v333_v20 = vor.u32 %v331_v55, %v329_v4 }
  0x58   :  { %v575_v29 = vsel %vm533_vm1, %v571_v6, %v574_v7  ;;  %v335_v33 = vshrl.u32 %v2535_v15, 16  ;;  %v699_v36 = vunpack.c.l.b16 %v574_v7  ;;  %vm1915_vm3 = vcmask 1041409  }
  0x59   :  { %1287 = vmatmul.mubr.bf16.gmra.mxu0 %v2416_v17  ;;  %v678_v17 = vunpack.c.h.b16 %v561_v43  ;;  %v46_v43 = vld [vmem:[%s2933_s0 + $0x6c] sm:$0xf]  ;;  %v502_v31 = vsel %vm484_vm2, %v500_v13, %v501_v14  ;;  %v696_v37 = vunpack.c.h.b16 %v575_v29  ;;  %v698_v24 = vunpack.c.l.b16 %v501_v14 }
  0x5a   :  { %1512 = vmatmul.mubr.bf16.gmra.mxu1 %v493_v22  ;;  %1294 = vmatprep.mubr.bf16.mxu0 %v2007_v18  ;;  %v2012_v18 = vcombine.low %v318_v8, %v330_v25  ;;  %v499_v22 = vsel %vm484_vm2, %v497_v9, %v498_v10  ;;  %v2539_v23 = vcombine.low %v2526_v41, %v46_v43  ;;  %v576_v49 = vrot.slane %v335_v33, 1 }
  0x5b   :  { %1519 = vmatprep.mubr.bf16.mxu1 %v2009_v1  ;;  %v875_v46 = vpack.c.b16 %v681_v35, %v678_v17  ;;  %v2014_v1 = vcombine.low %v567_v57, %v575_v29  ;;  %v694_v17 = vunpack.c.h.b16 %v330_v25  ;;  %v697_v35 = vunpack.c.l.b16 %v333_v20  ;;  %v2585_v25 = vld [vmem:[%s2933_s0 + $0x88] sm:$0xf]  ;;  %v54_v29 = vld [vmem:[%s2933_s0 + $0x8c] sm:$0xf]  ;;  %v2594_v20 = vld [vmem:[%s2933_s0 + $0x80] sm:$0xff]  }
  0x5c   :  { %v342_v38 = vshll.u32 %v2539_v23, 16  ;;  %v346_v39 = vshrl.u32 %v2539_v23, 16  ;;  %v886_v51 = vpack.c.b16 %v699_v36, %v696_v37  ;;  %v695_v12 = vunpack.c.h.b16 %v502_v31  ;;  %v2615_v36 = vld [vmem:[%s2933_s0 + $0x98] sm:$0xf] }
  0x5d   :  { %v884_v47 = vpack.c.b16 %v697_v35, %v694_v17  ;;  %v503_v9 = vrot.slane %v2535_v15, 1  ;;  %vm1918_vm4 = vcmask 1042434   ;;  %vm1921_vm5 = vcmask 1043459  }
  0x5e   :  { %v579_v52 = vrot.slane %v346_v39, 1  ;;  %v580_v53 = vrot.slane %v342_v38, 2  ;;  %vm1924_vm6 = vcmask 1044484   ;;  %vm1927_vm7 = vcmask 1045509  }
  0x5f   :  { %vm1930_vm8 = vcmask 1046534   ;;  %vm1933_vm9 = vcmask 1047559  }
  0x60   :  { %v581_v57 = vor.u32 %v580_v53, %v579_v52 }
  0x61   :  { %1295 = vmatmul.mubr.bf16.gmra.mxu0 %v2006_v42  ;;  %v1983_v42 = vcombine.low %v2544_v28, %v2549_v30 }
  0x62   :  { %1520 = vmatmul.mubr.bf16.gmra.mxu1 %v2008_v44  ;;  %1302 = vmatprep.mubr.bf16.mxu0 %v873_v45  ;;  %v2568_v44 = vcombine.low %v2557_v21, %v50_v34  ;;  %v2011_v45 = vcombine.low %v2467_v11, %v2485_v26  ;;  %v344_v26 = vrot.slane %v342_v38, 1 }
  0x63   :  { %1527 = vmatprep.mubr.bf16.mxu1 %v875_v46  ;;  %v2013_v46 = vcombine.low %v498_v10, %v502_v31  ;;  %v352_v54 = vshll.u32 %v1983_v42, 16  ;;  %v350_v55 = vshrl.u32 %v1983_v42, 16  ;;  %v504_v10 = vrot.slane %v2539_v23, 1  ;;  %v2603_v31 = vld [vmem:[%s2933_s0 + $0x90] sm:$0xf] }
  0x64   :  { %v357_v19 = vshll.u32 %v2568_v44, 16  ;;  %v361_v40 = vshrl.u32 %v2568_v44, 16  ;;  %v348_v8 = vor.u32 %v346_v39, %v344_v26  ;;  %v506_v43 = vrot.slane %v1983_v42, 1 }
  0x65   :  { %v354_v58 = vrot.slane %v352_v54, 1  ;;  %v583_v59 = vrot.slane %v350_v55, 1  ;;  %v584_v60 = vrot.slane %v352_v54, 2  ;;  %v507_v13 = vrot.slane %v2568_v44, 1 }
  0x66   :  { %v586_v61 = vrot.slane %v361_v40, 1  ;;  %v587_v62 = vrot.slane %v357_v19, 2  ;;  %v359_v4 = vrot.slane %v357_v19, 1  ;;  %v2598_v23 = vcombine.low %v2585_v25, %v54_v29 }
  0x67   :  { %v355_v3 = vor.u32 %v354_v58, %v350_v55  ;;  %v585_v6 = vor.u32 %v584_v60, %v583_v59  ;;  %v508_v34 = vsel %vm484_vm2, %v506_v43, %v507_v13  ;;  %v365_v39 = vshrl.u32 %v2594_v20, 16 }
  0x68   :  { %v588_v7 = vor.u32 %v587_v62, %v586_v61  ;;  %v363_v14 = vor.u32 %v361_v40, %v359_v4  ;;  %v372_v42 = vshll.u32 %v2598_v23, 16  ;;  %v376_v44 = vshrl.u32 %v2598_v23, 16 }
  0x69   :  { %1303 = vmatmul.mubr.bf16.gmra.mxu0 %v2010_v63  ;;  %v2015_v63 = vcombine.low %v2490_v27, %v2499_v32  ;;  %v360_v27 = vsel %vm243_vm0, %v355_v3, %v359_v4  ;;  %v590_v52 = vrot.slane %v365_v39, 1 }
  0x6a   :  { %1528 = vmatmul.mubr.bf16.gmra.mxu1 %v874_v0  ;;  %1310 = vmatprep.mubr.bf16.mxu0 %v315_v2  ;;  %v885_v0 = vpack.c.b16 %v698_v24, %v695_v12  ;;  %v589_v32 = vsel %vm533_vm1, %v585_v6, %v588_v7  ;;  %v712_v17 = vunpack.c.h.b16 %v360_v27  ;;  %v715_v35 = vunpack.c.l.b16 %v363_v14  ;;  %v2653_v14 = vld [vmem:[%s2933_s0 + $0xa0] sm:$0xff]  }
  0x6b   :  { %1535 = vmatprep.mubr.bf16.mxu1 %v568_v5  ;;  %v714_v37 = vunpack.c.h.b16 %v589_v32  ;;  %v717_v38 = vunpack.c.l.b16 %v588_v7  ;;  %v593_v54 = vrot.slane %v376_v44, 1  ;;  %v594_v55 = vrot.slane %v372_v42, 2 }
  0x71   :  { %1311 = vmatmul.mubr.bf16.gmra.mxu0 %v2476_v16  ;;  %v337_v16 = vshll.u32 %v2535_v15, 16 }
  0x72   :  { %1536 = vmatmul.mubr.bf16.gmra.mxu1 %v499_v22  ;;  %1318 = vmatprep.mubr.bf16.mxu0 %v2012_v18  ;;  %v2017_v18 = vcombine.low %v348_v8, %v360_v27  ;;  %v505_v22 = vsel %vm484_vm2, %v503_v9, %v504_v10  ;;  %v509_v9 = vrot.slane %v2594_v20, 1  ;;  %v2644_v27 = vld [vmem:[%s2933_s0 + $0xa8] sm:$0xf] }
  0x73   :  { %1543 = vmatprep.mubr.bf16.mxu1 %v2014_v1  ;;  %v339_v48 = vrot.slane %v337_v16, 1  ;;  %v577_v50 = vrot.slane %v337_v16, 2  ;;  %v2019_v1 = vcombine.low %v581_v57, %v589_v32  ;;  %v58_v16 = vld [vmem:[%s2933_s0 + $0x9c] sm:$0xf]  ;;  %v62_v32 = vld [vmem:[%s2933_s0 + $0xac] sm:$0xf] }
  0x75   :  { %v340_v11 = vor.u32 %v339_v48, %v335_v33  ;;  %v578_v56 = vor.u32 %v577_v50, %v576_v49  ;;  %v2608_v33 = vld [vmem:[%s2933_s0 + $0x94] sm:$0xf]  ;;  %v2018_v48 = vcombine.low %v504_v10, %v508_v34  ;;  %v895_v49 = vpack.c.b16 %v715_v35, %v712_v17 }
  0x76   :  { %v897_v50 = vpack.c.b16 %v717_v38, %v714_v37  ;;  %v510_v10 = vrot.slane %v2598_v23, 1  ;;  %v2657_v23 = vcombine.low %v2644_v27, %v62_v32  ;;  %v2667_v17 = vld [vmem:[%s2933_s0 + $0xb4] sm:$0xf]  ;;  %v395_v37 = vshrl.u32 %v2653_v14, 16  ;;  %v2675_v38 = vld [vmem:[%s2933_s0 + $0xb8] sm:$0xf] }
  0x77   :  { %v345_v2 = vsel %vm243_vm0, %v340_v11, %v344_v26  ;;  %v582_v5 = vsel %vm533_vm1, %v578_v56, %v581_v57  ;;  %v713_v11 = vunpack.c.h.b16 %v508_v34  ;;  %v716_v26 = vunpack.c.l.b16 %v507_v13  ;;  %v2662_v34 = vld [vmem:[%s2933_s0 + $0xb0] sm:$0xf] }
  0x78   :  { %v595_v57 = vor.u32 %v594_v55, %v593_v54  ;;  %v604_v54 = vrot.slane %v395_v37, 1 }
  0x79   :  { %1319 = vmatmul.mubr.bf16.gmra.mxu0 %v2011_v45  ;;  %v1987_v45 = vcombine.low %v2603_v31, %v2608_v33 }
  0x7a   :  { %1544 = vmatmul.mubr.bf16.gmra.mxu1 %v2013_v46  ;;  %1326 = vmatprep.mubr.bf16.mxu0 %v884_v47  ;;  %v2627_v46 = vcombine.low %v2615_v36, %v58_v16  ;;  %v2016_v47 = vcombine.low %v2526_v41, %v2544_v28  ;;  %v374_v41 = vrot.slane %v372_v42, 1 }
  0x7b   :  { %1551 = vmatprep.mubr.bf16.mxu1 %v886_v51  ;;  %v382_v19 = vshll.u32 %v1987_v45, 16  ;;  %v380_v40 = vshrl.u32 %v1987_v45, 16  ;;  %v512_v29 = vrot.slane %v1987_v45, 1  ;;  %v402_v45 = vshll.u32 %v2657_v23, 16 }
  0x7c   :  { %v387_v12 = vshll.u32 %v2627_v46, 16  ;;  %v391_v24 = vshrl.u32 %v2627_v46, 16  ;;  %v378_v8 = vor.u32 %v376_v44, %v374_v41  ;;  %v513_v43 = vrot.slane %v2627_v46, 1 }
  0x7d   :  { %v384_v58 = vrot.slane %v382_v19, 1  ;;  %v597_v59 = vrot.slane %v380_v40, 1  ;;  %v598_v60 = vrot.slane %v382_v19, 2  ;;  %v406_v46 = vshrl.u32 %v2657_v23, 16 }
  0x7e   :  { %v600_v61 = vrot.slane %v391_v24, 1  ;;  %v601_v62 = vrot.slane %v387_v12, 2  ;;  %v389_v4 = vrot.slane %v387_v12, 1  ;;  %v514_v35 = vsel %vm484_vm2, %v512_v29, %v513_v43 }
  0x7f   :  { %v385_v3 = vor.u32 %v384_v58, %v380_v40  ;;  %v599_v6 = vor.u32 %v598_v60, %v597_v59  ;;  %v607_v19 = vrot.slane %v406_v46, 1  ;;  %v608_v40 = vrot.slane %v402_v45, 2 }
  0x80   :  { %v602_v7 = vor.u32 %v601_v62, %v600_v61  ;;  %v393_v13 = vor.u32 %v391_v24, %v389_v4 }
  0x81   :  { %1327 = vmatmul.mubr.bf16.gmra.mxu0 %v2015_v63  ;;  %v2020_v63 = vcombine.low %v2549_v30, %v2557_v21  ;;  %v390_v30 = vsel %vm243_vm0, %v385_v3, %v389_v4 }
  0x82   :  { %1552 = vmatmul.mubr.bf16.gmra.mxu1 %v885_v0  ;;  %1334 = vmatprep.mubr.bf16.mxu0 %v345_v2  ;;  %v896_v0 = vpack.c.b16 %v716_v26, %v713_v11  ;;  %v603_v21 = vsel %vm533_vm1, %v599_v6, %v602_v7  ;;  %v733_v16 = vunpack.c.l.b16 %v393_v13  ;;  %v735_v44 = vunpack.c.l.b16 %v602_v7  ;;  %v2712_v13 = vld [vmem:[%s2933_s0 + $0xc0] sm:$0xff]  }
  0x83   :  { %1559 = vmatprep.mubr.bf16.mxu1 %v582_v5  ;;  %v732_v42 = vunpack.c.h.b16 %v603_v21 }
  0x89   :  { %1335 = vmatmul.mubr.bf16.gmra.mxu0 %v2535_v15  ;;  %v367_v15 = vshll.u32 %v2594_v20, 16 }
  0x8a   :  { %1560 = vmatmul.mubr.bf16.gmra.mxu1 %v505_v22  ;;  %1342 = vmatprep.mubr.bf16.mxu0 %v2017_v18  ;;  %v2022_v18 = vcombine.low %v378_v8, %v390_v30  ;;  %v511_v22 = vsel %vm484_vm2, %v509_v9, %v510_v10  ;;  %v515_v9 = vrot.slane %v2653_v14, 1 }
  0x8b   :  { %1567 = vmatprep.mubr.bf16.mxu1 %v2019_v1  ;;  %v369_v51 = vrot.slane %v367_v15, 1  ;;  %v591_v53 = vrot.slane %v367_v15, 2  ;;  %v2024_v1 = vcombine.low %v595_v57, %v603_v21  ;;  %v730_v15 = vunpack.c.h.b16 %v390_v30  ;;  %v2703_v30 = vld [vmem:[%s2933_s0 + $0xc8] sm:$0xf]  ;;  %v70_v21 = vld [vmem:[%s2933_s0 + $0xcc] sm:$0xf] }
  0x8d   :  { %v370_v28 = vor.u32 %v369_v51, %v365_v39  ;;  %v592_v56 = vor.u32 %v591_v53, %v590_v52  ;;  %v66_v39 = vld [vmem:[%s2933_s0 + $0xbc] sm:$0xf]  ;;  %v906_v51 = vpack.c.b16 %v733_v16, %v730_v15  ;;  %v908_v52 = vpack.c.b16 %v735_v44, %v732_v42  ;;  %v2726_v16 = vld [vmem:[%s2933_s0 + $0xd4] sm:$0xf]  ;;  %v2734_v42 = vld [vmem:[%s2933_s0 + $0xd8] sm:$0xf] }
  0x8e   :  { %v425_v15 = vshrl.u32 %v2712_v13, 16  ;;  %v74_v44 = vld [vmem:[%s2933_s0 + $0xdc] sm:$0xf] }
  0x8f   :  { %v375_v2 = vsel %vm243_vm0, %v370_v28, %v374_v41  ;;  %v596_v5 = vsel %vm533_vm1, %v592_v56, %v595_v57  ;;  %v731_v41 = vunpack.c.h.b16 %v514_v35  ;;  %v734_v28 = vunpack.c.l.b16 %v513_v43 }
  0x90   :  { %v609_v57 = vor.u32 %v608_v40, %v607_v19  ;;  %v618_v19 = vrot.slane %v425_v15, 1 }
  0x91   :  { %1343 = vmatmul.mubr.bf16.gmra.mxu0 %v2016_v47  ;;  %v1991_v47 = vcombine.low %v2662_v34, %v2667_v17 }
  0x92   :  { %1568 = vmatmul.mubr.bf16.gmra.mxu1 %v2018_v48  ;;  %1350 = vmatprep.mubr.bf16.mxu0 %v895_v49  ;;  %v2686_v48 = vcombine.low %v2675_v38, %v66_v39  ;;  %v2021_v49 = vcombine.low %v2585_v25, %v2603_v31  ;;  %v404_v31 = vrot.slane %v402_v45, 1 }
  0x93   :  { %1575 = vmatprep.mubr.bf16.mxu1 %v897_v50  ;;  %v2023_v50 = vcombine.low %v510_v10, %v514_v35  ;;  %v412_v12 = vshll.u32 %v1991_v47, 16  ;;  %v410_v24 = vshrl.u32 %v1991_v47, 16  ;;  %v516_v10 = vrot.slane %v2657_v23, 1  ;;  %v2721_v35 = vld [vmem:[%s2933_s0 + $0xd0] sm:$0xf] }
  0x94   :  { %v417_v11 = vshll.u32 %v2686_v48, 16  ;;  %v421_v26 = vshrl.u32 %v2686_v48, 16  ;;  %v408_v8 = vor.u32 %v406_v46, %v404_v31  ;;  %v518_v32 = vrot.slane %v1991_v47, 1 }
  0x95   :  { %v414_v58 = vrot.slane %v412_v12, 1  ;;  %v611_v59 = vrot.slane %v410_v24, 1  ;;  %v612_v60 = vrot.slane %v412_v12, 2  ;;  %v519_v29 = vrot.slane %v2686_v48, 1 }
  0x96   :  { %v614_v61 = vrot.slane %v421_v26, 1  ;;  %v615_v62 = vrot.slane %v417_v11, 2  ;;  %v419_v4 = vrot.slane %v417_v11, 1  ;;  %v2716_v23 = vcombine.low %v2703_v30, %v70_v21 }
  0x97   :  { %v415_v3 = vor.u32 %v414_v58, %v410_v24  ;;  %v613_v6 = vor.u32 %v612_v60, %v611_v59 }
  0x98   :  { %v616_v7 = vor.u32 %v615_v62, %v614_v61  ;;  %v423_v43 = vor.u32 %v421_v26, %v419_v4  ;;  %v432_v47 = vshll.u32 %v2716_v23, 16  ;;  %v436_v48 = vshrl.u32 %v2716_v23, 16 }
  0x99   :  { %1351 = vmatmul.mubr.bf16.gmra.mxu0 %v2020_v63  ;;  %v2025_v63 = vcombine.low %v2608_v33, %v2615_v36  ;;  %v420_v33 = vsel %vm243_vm0, %v415_v3, %v419_v4 }
  0x9a   :  { %1576 = vmatmul.mubr.bf16.gmra.mxu1 %v896_v0  ;;  %1358 = vmatprep.mubr.bf16.mxu0 %v375_v2  ;;  %v907_v0 = vpack.c.b16 %v734_v28, %v731_v41  ;;  %v617_v36 = vsel %vm533_vm1, %v613_v6, %v616_v7  ;;  %v751_v39 = vunpack.c.l.b16 %v423_v43  ;;  %v753_v46 = vunpack.c.l.b16 %v616_v7 }
  0x9b   :  { %1583 = vmatprep.mubr.bf16.mxu1 %v596_v5  ;;  %v750_v45 = vunpack.c.h.b16 %v617_v36  ;;  %v621_v12 = vrot.slane %v436_v48, 1  ;;  %v622_v24 = vrot.slane %v432_v47, 2 }
  0xa1   :  { %1359 = vmatmul.mubr.bf16.gmra.mxu0 %v2594_v20  ;;  %v397_v20 = vshll.u32 %v2653_v14, 16 }
  0xa2   :  { %1584 = vmatmul.mubr.bf16.gmra.mxu1 %v511_v22  ;;  %1366 = vmatprep.mubr.bf16.mxu0 %v2022_v18  ;;  %v2027_v18 = vcombine.low %v408_v8, %v420_v33  ;;  %v517_v22 = vsel %vm484_vm2, %v515_v9, %v516_v10  ;;  %v521_v9 = vrot.slane %v2712_v13, 1 }
  0xa3   :  { %1591 = vmatprep.mubr.bf16.mxu1 %v2024_v1  ;;  %v399_v53 = vrot.slane %v397_v20, 1  ;;  %v605_v55 = vrot.slane %v397_v20, 2  ;;  %v2029_v1 = vcombine.low %v609_v57, %v617_v36  ;;  %v748_v20 = vunpack.c.h.b16 %v420_v33  ;;  %v78_v33 = vld [vmem:[%s2933_s0 + $0xec] sm:$0xf] }
  0xa5   :  { %v400_v25 = vor.u32 %v399_v53, %v395_v37  ;;  %v606_v56 = vor.u32 %v605_v55, %v604_v54  ;;  %v520_v37 = vsel %vm484_vm2, %v518_v32, %v519_v29  ;;  %v917_v53 = vpack.c.b16 %v751_v39, %v748_v20  ;;  %v2785_v39 = vld [vmem:[%s2933_s0 + $0xf4] sm:$0xf]  ;;  %v2793_v20 = vld [vmem:[%s2933_s0 + $0xf8] sm:$0xf] }
  0xa6   :  { %v919_v54 = vpack.c.b16 %v753_v46, %v750_v45  ;;  %v82_v45 = vld [vmem:[%s2933_s0 + $0xfc] sm:$0xf] }
  0xa7   :  { %v405_v2 = vsel %vm243_vm0, %v400_v25, %v404_v31  ;;  %v610_v5 = vsel %vm533_vm1, %v606_v56, %v609_v57  ;;  %v749_v25 = vunpack.c.h.b16 %v520_v37  ;;  %v752_v31 = vunpack.c.l.b16 %v519_v29  ;;  %v2771_v29 = vld [vmem:[%s2933_s0 + $0xe0] sm:$0xff]  }
  0xa8   :  { %v623_v57 = vor.u32 %v622_v24, %v621_v12 }
  0xa9   :  { %1367 = vmatmul.mubr.bf16.gmra.mxu0 %v2021_v49  ;;  %v1995_v49 = vcombine.low %v2721_v35, %v2726_v16 }
  0xaa   :  { %1592 = vmatmul.mubr.bf16.gmra.mxu1 %v2023_v50  ;;  %1374 = vmatprep.mubr.bf16.mxu0 %v906_v51  ;;  %v2745_v50 = vcombine.low %v2734_v42, %v74_v44  ;;  %v2026_v51 = vcombine.low %v2644_v27, %v2662_v34  ;;  %v434_v34 = vrot.slane %v432_v47, 1  ;;  %v455_v44 = vshrl.u32 %v2771_v29, 16 }
  0xab   :  { %1599 = vmatprep.mubr.bf16.mxu1 %v908_v52  ;;  %v2028_v52 = vcombine.low %v516_v10, %v520_v37  ;;  %v442_v11 = vshll.u32 %v1995_v49, 16  ;;  %v440_v26 = vshrl.u32 %v1995_v49, 16  ;;  %v522_v10 = vrot.slane %v2716_v23, 1  ;;  %v2780_v37 = vld [vmem:[%s2933_s0 + $0xf0] sm:$0xf] }
  0xac   :  { %v447_v41 = vshll.u32 %v2745_v50, 16  ;;  %v451_v28 = vshrl.u32 %v2745_v50, 16  ;;  %v438_v8 = vor.u32 %v436_v48, %v434_v34  ;;  %v524_v21 = vrot.slane %v1995_v49, 1 }
  0xad   :  { %v444_v58 = vrot.slane %v442_v11, 1  ;;  %v625_v59 = vrot.slane %v440_v26, 1  ;;  %v626_v60 = vrot.slane %v442_v11, 2  ;;  %v525_v32 = vrot.slane %v2745_v50, 1 }
  0xae   :  { %v628_v61 = vrot.slane %v451_v28, 1  ;;  %v629_v62 = vrot.slane %v447_v41, 2  ;;  %v449_v4 = vrot.slane %v447_v41, 1  ;;  %v457_v47 = vshll.u32 %v2771_v29, 16 }
  0xaf   :  { %v445_v3 = vor.u32 %v444_v58, %v440_v26  ;;  %v627_v6 = vor.u32 %v626_v60, %v625_v59 }
  0xb0   :  { %v630_v7 = vor.u32 %v629_v62, %v628_v61  ;;  %v633_v12 = vrot.slane %v457_v47, 2 }
  0xb1   :  { %1375 = vmatmul.mubr.bf16.gmra.mxu0 %v2025_v63  ;;  %v2030_v63 = vcombine.low %v2667_v17, %v2675_v38  ;;  %v450_v17 = vsel %vm243_vm0, %v445_v3, %v449_v4  ;;  %v2761_v38 = vld [vmem:[%s2933_s0 + $0xe8] sm:$0xf] }
  0xb2   :  { %1600 = vmatmul.mubr.bf16.gmra.mxu1 %v907_v0  ;;  %1382 = vmatprep.mubr.bf16.mxu0 %v405_v2  ;;  %v918_v0 = vpack.c.b16 %v752_v31, %v749_v25  ;;  %v631_v36 = vsel %vm533_vm1, %v627_v6, %v630_v7  ;;  %v2032_v43 = vcombine.low %v438_v8, %v450_v17  ;;  %v766_v46 = vunpack.c.h.b16 %v450_v17 }
  0xb3   :  { %1607 = vmatprep.mubr.bf16.mxu1 %v610_v5  ;;  %v2034_v23 = vcombine.low %v623_v57, %v631_v36  ;;  %v768_v48 = vunpack.c.h.b16 %v631_v36  ;;  %v771_v49 = vunpack.c.l.b16 %v630_v7 }
  0xb5   :  { %v930_v24 = vpack.c.b16 %v771_v49, %v768_v48 }
  0xb9   :  { %1383 = vmatmul.mubr.bf16.gmra.mxu0 %v2653_v14  ;;  %v427_v14 = vshll.u32 %v2712_v13, 16 }
  0xba   :  { %1608 = vmatmul.mubr.bf16.gmra.mxu1 %v517_v22  ;;  %1390 = vmatprep.mubr.bf16.mxu0 %v2027_v18  ;;  %v453_v18 = vor.u32 %v451_v28, %v449_v4  ;;  %v2774_v22 = vcombine.low %v2761_v38, %v78_v33 }
  0xbb   :  { %1615 = vmatprep.mubr.bf16.mxu1 %v2029_v1  ;;  %v429_v55 = vrot.slane %v427_v14, 1  ;;  %v619_v40 = vrot.slane %v427_v14, 2  ;;  %v523_v1 = vsel %vm484_vm2, %v521_v9, %v522_v10  ;;  %v527_v9 = vrot.slane %v2771_v29, 1 }
  0xbc   :  { %v769_v14 = vunpack.c.l.b16 %v453_v18  ;;  %v466_v50 = vshrl.u32 %v2774_v22, 16 }
  0xbd   :  { %v430_v27 = vor.u32 %v429_v55, %v425_v15  ;;  %v620_v56 = vor.u32 %v619_v40, %v618_v19  ;;  %v526_v15 = vsel %vm484_vm2, %v524_v21, %v525_v32  ;;  %v459_v19 = vrot.slane %v457_v47, 1 }
  0xbe   :  { %v928_v55 = vpack.c.b16 %v769_v14, %v766_v46  ;;  %v632_v40 = vrot.slane %v455_v44, 1  ;;  %v635_v11 = vrot.slane %v466_v50, 1 }
  0xbf   :  { %v435_v2 = vsel %vm243_vm0, %v430_v27, %v434_v34  ;;  %v624_v5 = vsel %vm533_vm1, %v620_v56, %v623_v57  ;;  %v767_v27 = vunpack.c.h.b16 %v526_v15  ;;  %v770_v34 = vunpack.c.l.b16 %v525_v32 }
  0xc0   :  { %v634_v56 = vor.u32 %v633_v12, %v632_v40 }
  0xc1   :  { %1391 = vmatmul.mubr.bf16.gmra.mxu0 %v2026_v51  ;;  %v1999_v51 = vcombine.low %v2780_v37, %v2785_v39 }
  0xc2   :  { %1616 = vmatmul.mubr.bf16.gmra.mxu1 %v2028_v52  ;;  %1398 = vmatprep.mubr.bf16.mxu0 %v917_v53  ;;  %v2804_v52 = vcombine.low %v2793_v20, %v82_v45  ;;  %v2031_v53 = vcombine.low %v2703_v30, %v2721_v35  ;;  %v460_v35 = vor.u32 %v459_v19, %v455_v44 }
  0xc3   :  { %1623 = vmatprep.mubr.bf16.mxu1 %v919_v54  ;;  %v2033_v54 = vcombine.low %v522_v10, %v526_v15  ;;  %v472_v41 = vshll.u32 %v1999_v51, 16  ;;  %v470_v28 = vshrl.u32 %v1999_v51, 16  ;;  %v528_v10 = vrot.slane %v2774_v22, 1 }
  0xc4   :  { %v477_v25 = vshll.u32 %v2804_v52, 16  ;;  %v481_v31 = vshrl.u32 %v2804_v52, 16  ;;  %v530_v32 = vrot.slane %v1999_v51, 1  ;;  %v2036_v44 = vcombine.low %v2761_v38, %v2780_v37 }
  0xc5   :  { %v474_v58 = vrot.slane %v472_v41, 1  ;;  %v639_v59 = vrot.slane %v470_v28, 1  ;;  %v640_v60 = vrot.slane %v472_v41, 2  ;;  %v529_v36 = vsel %vm484_vm2, %v527_v9, %v528_v10 }
  0xc6   :  { %v642_v61 = vrot.slane %v481_v31, 1  ;;  %v643_v62 = vrot.slane %v477_v25, 2  ;;  %v479_v4 = vrot.slane %v477_v25, 1 }
  0xc7   :  { %v475_v3 = vor.u32 %v474_v58, %v470_v28  ;;  %v641_v6 = vor.u32 %v640_v60, %v639_v59 }
  0xc8   :  { %v644_v7 = vor.u32 %v643_v62, %v642_v61  ;;  %v483_v33 = vor.u32 %v481_v31, %v479_v4 }
  0xc9   :  { %1399 = vmatmul.mubr.bf16.gmra.mxu0 %v2030_v63  ;;  %v2035_v63 = vcombine.low %v2726_v16, %v2734_v42  ;;  %v480_v16 = vsel %vm243_vm0, %v475_v3, %v479_v4 }
  0xca   :  { %1624 = vmatmul.mubr.bf16.gmra.mxu1 %v918_v0  ;;  %1406 = vmatprep.mubr.bf16.mxu0 %v435_v2  ;;  %v929_v0 = vpack.c.b16 %v770_v34, %v767_v27  ;;  %v645_v42 = vsel %vm533_vm1, %v641_v6, %v644_v7  ;;  %v784_v18 = vunpack.c.h.b16 %v480_v16  ;;  %v789_v15 = vunpack.c.l.b16 %v644_v7 }
  0xcb   :  { %1631 = vmatprep.mubr.bf16.mxu1 %v624_v5 }
  0xd1   :  { %1407 = vmatmul.mubr.bf16.gmra.mxu0 %v2712_v13  ;;  %v462_v13 = vshll.u32 %v2774_v22, 16 }
  0xd2   :  { %1632 = vmatmul.mubr.bf16.gmra.mxu1 %v523_v1  ;;  %1414 = vmatprep.mubr.bf16.mxu0 %v2032_v43  ;;  %v531_v43 = vrot.slane %v2804_v52, 1  ;;  %v787_v1 = vunpack.c.l.b16 %v483_v33 }
  0xd3   :  { %1639 = vmatprep.mubr.bf16.mxu1 %v2034_v23  ;;  %v636_v26 = vrot.slane %v462_v13, 2  ;;  %v464_v30 = vrot.slane %v462_v13, 1  ;;  %v786_v23 = vunpack.c.h.b16 %v645_v42  ;;  %v2040_v13 = vcombine.low %v2785_v39, %v2793_v20 }
  0xd4   :  { %v532_v22 = vsel %vm484_vm2, %v530_v32, %v531_v43  ;;  %v939_v46 = vpack.c.b16 %v787_v1, %v784_v18 }
  0xd5   :  { %v637_v57 = vor.u32 %v636_v26, %v635_v11  ;;  %v465_v2 = vsel %vm243_vm0, %v460_v35, %v464_v30  ;;  %v468_v8 = vor.u32 %v466_v50, %v464_v30  ;;  %v2038_v45 = vcombine.low %v528_v10, %v532_v22  ;;  %v2841_v26 = vld [vmem:[%s2936_s3 + $0x10] sm:$0xff] }
  0xd6   :  { %v941_v14 = vpack.c.b16 %v789_v15, %v786_v23  ;;  %v785_v47 = vunpack.c.h.b16 %v532_v22 }
  0xd7   :  { %v638_v5 = vsel %vm533_vm1, %v634_v56, %v637_v57  ;;  %v2037_v17 = vcombine.low %v468_v8, %v480_v16  ;;  %v2039_v21 = vcombine.low %v637_v57, %v645_v42 }
  0xd9   :  { %1415 = vmatmul.mubr.bf16.gmra.mxu0 %v2031_v53  ;;  %v2829_v53 = vld [vmem:[%s2936_s3] sm:$0xff] }
  0xda   :  { %1640 = vmatmul.mubr.bf16.gmra.mxu1 %v2033_v54  ;;  %1422 = vmatprep.mubr.bf16.mxu0 %v928_v55  ;;  %v2834_v55 = vld [vmem:[%s2936_s3 + $0x8] sm:$0xff] }
  0xdb   :  { %1647 = vmatprep.mubr.bf16.mxu1 %v930_v24 }
  0xe1   :  { %1423 = vmatmul.mubr.bf16.gmra.mxu0 %v2035_v63 }
  0xe2   :  { %1648 = vmatmul.mubr.bf16.gmra.mxu1 %v929_v0  ;;  %1430 = vmatprep.mubr.bf16.mxu0 %v465_v2 }
  0xe3   :  { %1655 = vmatprep.mubr.bf16.mxu1 %v638_v5 }
  0xe9   :  { %1431 = vmatmul.mubr.bf16.gmra.mxu0 %v2771_v29  ;;  %v788_v29 = vunpack.c.l.b16 %v531_v43 }
  0xea   :  { %1656 = vmatmul.mubr.bf16.gmra.mxu1 %v529_v36  ;;  %1438 = vmatprep.mubr.bf16.mxu0 %v2037_v17 }
  0xeb   :  { %1663 = vmatprep.mubr.bf16.mxu1 %v2039_v21  ;;  %v940_v48 = vpack.c.b16 %v788_v29, %v785_v47 }
  0xf1   :  { %1439 = vmatmul.mubr.bf16.gmra.mxu0 %v2036_v44 }
  0xf2   :  { %1664 = vmatmul.mubr.bf16.gmra.mxu1 %v2038_v45  ;;  %1446 = vmatprep.mubr.bf16.mxu0 %v939_v46 }
  0xf3   :  { %1671 = vmatprep.mubr.bf16.mxu1 %v941_v14 }
  0xf9   :  { %1447 = vmatmul.mubr.bf16.gmra.mxu0 %v2040_v13 }
  0xfa   :  { %1672 = vmatmul.mubr.bf16.gmra.mxu1 %v940_v48 }
 0x101   :  { %v1264_v49 = vpop.f32.mrf.mxu0 }
 0x102   :  { %v1489_v50 = vpop.f32.mrf.mxu1 }
 0x103   :  { %v1490_v51 = vadd.f32 %v1489_v50, %v1264_v49  ;;  %v1266_v52 = vpop.f32.mrf.mxu0 }
 0x104   :  { %v1491_v38 = vpop.f32.mrf.mxu1  ;;  %v2850_v52 = vld [vmem:[%s2935_s2] ss:$0 sm:$0xff]  ;;  %s2181_s2 = smov [#allocation2]  }
 0x105   :  { %v1267_v37 = vpop.f32.mrf.mxu0  ;;  %v1683_v40 = vadd.f32 %v2829_v53, %v1490_v51  ;;  %s1958_s11 = sshll.u32 %s2181_s2, 4  ;;  %s1959_s11 = int_to_ptr.vmem [resolvable:$true] %s1958_s11 }
 0x106   :  { %v1492_v54 = vpop.f32.mrf.mxu1  ;;  %s2158_s12 = scalar_lea.vmem %s1959_s11, 256  ;;  %p2163_p1 = scmp.lt.s32.totalorder %s1959_s11, %s1959_s11 }
 0x107   :  { %v1493_v39 = vadd.f32 %v1492_v54, %v1267_v37  ;;  %v1269_v20 = vpop.f32.mrf.mxu0  ;;  %p2159_p0 = scmp.ne.s32.totalorder %s1959_s11, %s2158_s12  ;;  %p2164_p2 = scmp.lt.s32.totalorder %s2158_s12, %s2158_s12 }
 0x108   :  { %v1494_v19 = vpop.f32.mrf.mxu1 }
 0x109   :  { %v1684_v12 = vadd.f32 %v2834_v55, %v1493_v39  ;;  %v1272_v24 = vpop.f32.mrf.mxu0  ;;  %p2165_p3 = por %p2164_p2, %p2163_p1 }
 0x10a   :  { %v1497_v11 = vpop.f32.mrf.mxu1 }
 0x10b   :  { %v1731_v41 = vmax.f32 %v1683_v40, %v1684_v12  ;;  %v1498_v28 = vadd.f32 %v1497_v11, %v1272_v24  ;;  %v1274_v25 = vpop.f32.mrf.mxu0  ;;  %p2166_p4 = pnand %p2165_p3, %p2159_p0 }
 0x10c   :  { %v1499_v31 = vpop.f32.mrf.mxu1 }
 0x10d   :  { %v1685_v27 = vadd.f32 %v2841_v26, %v1498_v28  ;;  %v1275_v34 = vpop.f32.mrf.mxu0 }
 0x10e   :  { %v1500_v30 = vpop.f32.mrf.mxu1 }
 0x10f   :  { %v1732_v35 = vmax.f32 %v1731_v41, %v1685_v27  ;;  %v1501_v56 = vadd.f32 %v1500_v30, %v1275_v34  ;;  %v1277_v57 = vpop.f32.mrf.mxu0 }
 0x110   :  { %v1502_v58 = vpop.f32.mrf.mxu1 }
 0x111   :  { %v1733_v59 = vrot.slane %v1732_v35, 4  ;;  %v1280_v60 = vpop.f32.mrf.mxu0  ;;  %v1686_v3 = vadd.f32 %v2829_v53, %v1501_v56 }
 0x112   :  { %v1505_v61 = vpop.f32.mrf.mxu1 }
 0x113   :  { %v1506_v62 = vadd.f32 %v1505_v61, %v1280_v60  ;;  %v1282_v63 = vpop.f32.mrf.mxu0  ;;  %v1734_v2 = vmax.f32 %v1732_v35, %v1733_v59 }
 0x114   :  { %v1507_v0 = vpop.f32.mrf.mxu1 }
 0x115   :  { %v1687_v4 = vadd.f32 %v2834_v55, %v1506_v62  ;;  %v1283_v5 = vpop.f32.mrf.mxu0  ;;  %v1735_v16 = vrot.slane %v1734_v2, 2 }
 0x116   :  { %v1508_v6 = vpop.f32.mrf.mxu1 }
 0x117   :  { %v1739_v7 = vmax.f32 %v1686_v3, %v1687_v4  ;;  %v1509_v8 = vadd.f32 %v1508_v6, %v1283_v5  ;;  %v1285_v9 = vpop.f32.mrf.mxu0  ;;  %v1736_v43 = vmax.f32 %v1734_v2, %v1735_v16 }
 0x118   :  { %v1510_v10 = vpop.f32.mrf.mxu1 }
 0x119   :  { %v1688_v42 = vadd.f32 %v2841_v26, %v1509_v8  ;;  %v1288_v17 = vpop.f32.mrf.mxu0  ;;  %v1737_v45 = vrot.slane %v1736_v43, 1 }
 0x11a   :  { %v1513_v33 = vpop.f32.mrf.mxu1 }
 0x11b   :  { %v1740_v36 = vmax.f32 %v1739_v7, %v1688_v42  ;;  %v1290_v21 = vpop.f32.mrf.mxu0  ;;  %v1738_v49 = vmax.f32 %v1736_v43, %v1737_v45  ;;  %v1514_v16 = vadd.f32 %v1513_v33, %v1288_v17 }
 0x11c   :  { %v1515_v32 = vpop.f32.mrf.mxu1 }
 0x11d   :  { %v1741_v18 = vrot.slane %v1740_v36, 4  ;;  %v1291_v1 = vpop.f32.mrf.mxu0  ;;  %v1866_v20 = vadd.f32 %v2850_v52, %v1738_v49 }
 0x11e   :  { %v1516_v22 = vpop.f32.mrf.mxu1 }
 0x11f   :  { %v1742_v23 = vmax.f32 %v1740_v36, %v1741_v18  ;;  %v1293_v15 = vpop.f32.mrf.mxu0  ;;  %v1882_v28 = vmax.f32 %v1866_v20, 0.0  ;;  %v1517_v7 = vadd.f32 %v1516_v22, %v1291_v1  ;;  %v1689_v22 = vadd.f32 %v2829_v53, %v1514_v16 }
 0x120   :  { %v1518_v44 = vpop.f32.mrf.mxu1 }
 0x121   :  { %v1743_v46 = vrot.slane %v1742_v23, 2  ;;  %v1296_v14 = vpop.f32.mrf.mxu0 }
 0x122   :  { %v1521_v47 = vpop.f32.mrf.mxu1 }
 0x123   :  { %v1744_v29 = vmax.f32 %v1742_v23, %v1743_v46  ;;  %v1298_v13 = vpop.f32.mrf.mxu0  ;;  %v1522_v42 = vadd.f32 %v1521_v47, %v1296_v14  ;;  %v1690_v23 = vadd.f32 %v2834_v55, %v1517_v7 }
 0x124   :  { %v1523_v48 = vpop.f32.mrf.mxu1 }
 0x125   :  { %v1745_v50 = vrot.slane %v1744_v29, 1  ;;  %v1299_v51 = vpop.f32.mrf.mxu0  ;;  %v1691_v17 = vadd.f32 %v2841_v26, %v1522_v42 }
 0x126   :  { %v1524_v38 = vpop.f32.mrf.mxu1 }
 0x127   :  { %v1746_v37 = vmax.f32 %v1744_v29, %v1745_v50  ;;  %v1301_v54 = vpop.f32.mrf.mxu0  ;;  %v1525_v32 = vadd.f32 %v1524_v38, %v1299_v51  ;;  %v1747_v51 = vmax.f32 %v1689_v22, %v1690_v23 }
 0x128   :  { %v1526_v39 = vpop.f32.mrf.mxu1 }
 0x129   :  { %v1867_v19 = vadd.f32 %v2850_v52, %v1746_v37  ;;  %v1304_v40 = vpop.f32.mrf.mxu0  ;;  %v1692_v47 = vadd.f32 %v2829_v53, %v1525_v32 }
 0x12a   :  { %v1529_v12 = vpop.f32.mrf.mxu1 }
 0x12b   :  { %v1883_v24 = vmax.f32 %v1867_v19, 0.0  ;;  %v1306_v11 = vpop.f32.mrf.mxu0  ;;  %v1530_v9 = vadd.f32 %v1529_v12, %v1304_v40  ;;  %v1748_v12 = vmax.f32 %v1747_v51, %v1691_v17 }
 0x12c   :  { %v1531_v41 = vpop.f32.mrf.mxu1 }
 0x12d   :  { %v1914_v25 = vrot.slane %v1883_v24, 7  ;;  %v1307_v31 = vpop.f32.mrf.mxu0  ;;  %v1693_v29 = vadd.f32 %v2834_v55, %v1530_v9 }
 0x12e   :  { %v1532_v27 = vpop.f32.mrf.mxu1 }
 0x12f   :  { %v2855_v34 = vsel %vm1915_vm3, %v1914_v25, %v1882_v28  ;;  %v1309_v30 = vpop.f32.mrf.mxu0  ;;  %v1533_v43 = vadd.f32 %v1532_v27, %v1307_v31  ;;  %v1755_v20 = vmax.f32 %v1692_v47, %v1693_v29 }
 0x130   :  { %v1534_v35 = vpop.f32.mrf.mxu1 }
 0x131   :  { %v1312_v56 = vpop.f32.mrf.mxu0  ;;  %v1694_v48 = vadd.f32 %v2841_v26, %v1533_v43 }
 0x132   :  { %v1537_v57 = vpop.f32.mrf.mxu1 }
 0x133   :  { %v1314_v58 = vpop.f32.mrf.mxu0  ;;  %v1538_v15 = vadd.f32 %v1537_v57, %v1312_v56  ;;  %v1756_v28 = vmax.f32 %v1755_v20, %v1694_v48  ;;  %v1749_v57 = vrot.slane %v1748_v12, 4 }
 0x134   :  { %v1539_v59 = vpop.f32.mrf.mxu1 }
 0x135   :  { %v1315_v60 = vpop.f32.mrf.mxu0  ;;  %v1695_v38 = vadd.f32 %v2829_v53, %v1538_v15  ;;  %v1757_v59 = vrot.slane %v1756_v28, 4 }
 0x136   :  { %v1540_v61 = vpop.f32.mrf.mxu1 }
 0x137   :  { %v1317_v62 = vpop.f32.mrf.mxu0  ;;  %v1541_v36 = vadd.f32 %v1540_v61, %v1315_v60  ;;  %v1758_v7 = vmax.f32 %v1756_v28, %v1757_v59 }
 0x138   :  { %v1542_v63 = vpop.f32.mrf.mxu1 }
 0x139   :  { %v1320_v0 = vpop.f32.mrf.mxu0  ;;  %v1696_v33 = vadd.f32 %v2834_v55, %v1541_v36  ;;  %v1759_v15 = vrot.slane %v1758_v7, 2 }
 0x13a   :  { %v1545_v2 = vpop.f32.mrf.mxu1 }
 0x13b   :  { %v1322_v3 = vpop.f32.mrf.mxu0  ;;  %v1546_v44 = vadd.f32 %v1545_v2, %v1320_v0  ;;  %v1763_v24 = vmax.f32 %v1695_v38, %v1696_v33 }
 0x13c   :  { %v1547_v4 = vpop.f32.mrf.mxu1 }
 0x13d   :  { %v1323_v5 = vpop.f32.mrf.mxu0  ;;  %v1697_v37 = vadd.f32 %v2841_v26, %v1546_v44  ;;  %v1750_v4 = vmax.f32 %v1748_v12, %v1749_v57 }
 0x13e   :  { %v1548_v6 = vpop.f32.mrf.mxu1 }
 0x13f   :  { %v1325_v8 = vpop.f32.mrf.mxu0  ;;  %v1549_v13 = vadd.f32 %v1548_v6, %v1323_v5  ;;  %v1764_v27 = vmax.f32 %v1763_v24, %v1697_v37  ;;  %v1751_v32 = vrot.slane %v1750_v4, 2 }
 0x140   :  { %v1550_v10 = vpop.f32.mrf.mxu1 }
 0x141   :  { %v1328_v21 = vpop.f32.mrf.mxu0  ;;  %v1698_v19 = vadd.f32 %v2829_v53, %v1549_v13  ;;  %v1765_v61 = vrot.slane %v1764_v27, 4  ;;  %v1752_v22 = vmax.f32 %v1750_v4, %v1751_v32 }
 0x142   :  { %v1553_v18 = vpop.f32.mrf.mxu1 }
 0x143   :  { %v1554_v45 = vadd.f32 %v1553_v18, %v1328_v21  ;;  %v1330_v46 = vpop.f32.mrf.mxu0  ;;  %v1766_v9 = vmax.f32 %v1764_v27, %v1765_v61 }
 0x144   :  { %v1555_v1 = vpop.f32.mrf.mxu1 }
 0x145   :  { %v1331_v14 = vpop.f32.mrf.mxu0  ;;  %v1699_v49 = vadd.f32 %v2834_v55, %v1554_v45  ;;  %v1767_v45 = vrot.slane %v1766_v9, 2 }
 0x146   :  { %v1556_v50 = vpop.f32.mrf.mxu1 }
 0x147   :  { %v1557_v54 = vadd.f32 %v1556_v50, %v1331_v14  ;;  %v1333_v39 = vpop.f32.mrf.mxu0  ;;  %v1771_v25 = vmax.f32 %v1698_v19, %v1699_v49  ;;  %v1760_v14 = vmax.f32 %v1758_v7, %v1759_v15  ;;  %v1768_v48 = vmax.f32 %v1766_v9, %v1767_v45 }
 0x148   :  { %v1558_v40 = vpop.f32.mrf.mxu1  ;;  %v1753_v39 = vrot.slane %v1752_v22, 1 }
 0x149   :  { %v1700_v11 = vadd.f32 %v2841_v26, %v1557_v54  ;;  %v1336_v41 = vpop.f32.mrf.mxu0  ;;  %v1761_v12 = vrot.slane %v1760_v14, 1 }
 0x14a   :  { %v1561_v31 = vpop.f32.mrf.mxu1 }
 0x14b   :  { %v1338_v30 = vpop.f32.mrf.mxu0  ;;  %v1772_v35 = vmax.f32 %v1771_v25, %v1700_v11  ;;  %v1562_v62 = vadd.f32 %v1561_v31, %v1336_v41  ;;  %v1769_v11 = vrot.slane %v1768_v48, 1  ;;  %v1762_v59 = vmax.f32 %v1760_v14, %v1761_v12 }
 0x14c   :  { %v1563_v56 = vpop.f32.mrf.mxu1 }
 0x14d   :  { %v1339_v58 = vpop.f32.mrf.mxu0  ;;  %v1773_v2 = vrot.slane %v1772_v35, 4  ;;  %v1701_v10 = vadd.f32 %v2829_v53, %v1562_v62  ;;  %v1770_v62 = vmax.f32 %v1768_v48, %v1769_v11 }
 0x14e   :  { %v1564_v60 = vpop.f32.mrf.mxu1 }
 0x14f   :  { %v1565_v63 = vadd.f32 %v1564_v60, %v1339_v58  ;;  %v1341_v0 = vpop.f32.mrf.mxu0  ;;  %v1774_v36 = vmax.f32 %v1772_v35, %v1773_v2  ;;  %v1754_v35 = vmax.f32 %v1752_v22, %v1753_v39 }
 0x150   :  { %v1566_v3 = vpop.f32.mrf.mxu1 }
 0x151   :  { %v1702_v5 = vadd.f32 %v2834_v55, %v1565_v63  ;;  %v1344_v6 = vpop.f32.mrf.mxu0  ;;  %v1775_v13 = vrot.slane %v1774_v36, 2 }
 0x152   :  { %v1569_v8 = vpop.f32.mrf.mxu1 }
 0x153   :  { %v1570_v16 = vadd.f32 %v1569_v8, %v1344_v6  ;;  %v1346_v42 = vpop.f32.mrf.mxu0  ;;  %v1779_v43 = vmax.f32 %v1701_v10, %v1702_v5  ;;  %v1776_v37 = vmax.f32 %v1774_v36, %v1775_v13  ;;  %v1868_v5 = vadd.f32 %v2850_v52, %v1754_v35 }
 0x154   :  { %v1571_v21 = vpop.f32.mrf.mxu1  ;;  %v1869_v8 = vadd.f32 %v2850_v52, %v1762_v59 }
 0x155   :  { %v1703_v18 = vadd.f32 %v2841_v26, %v1570_v16  ;;  %v1347_v23 = vpop.f32.mrf.mxu0  ;;  %v1777_v27 = vrot.slane %v1776_v37, 1  ;;  %v1870_v16 = vadd.f32 %v2850_v52, %v1770_v62 }
 0x156   :  { %v1572_v44 = vpop.f32.mrf.mxu1 }
 0x157   :  { %v1780_v46 = vmax.f32 %v1779_v43, %v1703_v18  ;;  %v1349_v29 = vpop.f32.mrf.mxu0  ;;  %v1573_v50 = vadd.f32 %v1572_v44, %v1347_v23  ;;  %v1778_v3 = vmax.f32 %v1776_v37, %v1777_v27  ;;  %v1884_v18 = vmax.f32 %v1868_v5, 0.0 }
 0x158   :  { %v1574_v1 = vpop.f32.mrf.mxu1 }
 0x159   :  { %v1781_v17 = vrot.slane %v1780_v46, 4  ;;  %v1352_v33 = vpop.f32.mrf.mxu0  ;;  %v1704_v28 = vadd.f32 %v2829_v53, %v1573_v50  ;;  %v1871_v32 = vadd.f32 %v2850_v52, %v1778_v3  ;;  %v1886_v1 = vmax.f32 %v1870_v16, 0.0 }
 0x15a   :  { %v1577_v47 = vpop.f32.mrf.mxu1 }
 0x15b   :  { %v1782_v49 = vmax.f32 %v1780_v46, %v1781_v17  ;;  %v1578_v51 = vadd.f32 %v1577_v47, %v1352_v33  ;;  %v1354_v38 = vpop.f32.mrf.mxu0  ;;  %v1885_v46 = vmax.f32 %v1869_v8, 0.0  ;;  %v1887_v47 = vmax.f32 %v1871_v32, 0.0 }
 0x15c   :  { %v1579_v54 = vpop.f32.mrf.mxu1 }
 0x15d   :  { %v1783_v20 = vrot.slane %v1782_v49, 2  ;;  %v1705_v19 = vadd.f32 %v2834_v55, %v1578_v51  ;;  %v1355_v40 = vpop.f32.mrf.mxu0  ;;  %v1920_v37 = vrot.slane %v1885_v46, 5  ;;  %v1926_v11 = vrot.slane %v1887_v47, 3 }
 0x15e   :  { %v1580_v24 = vpop.f32.mrf.mxu1 }
 0x15f   :  { %v1784_v41 = vmax.f32 %v1782_v49, %v1783_v20  ;;  %v1581_v25 = vadd.f32 %v1580_v24, %v1355_v40  ;;  %v1357_v31 = vpop.f32.mrf.mxu0  ;;  %v1787_v56 = vmax.f32 %v1704_v28, %v1705_v19  ;;  %v1917_v49 = vrot.slane %v1884_v18, 6 }
 0x160   :  { %v1582_v30 = vpop.f32.mrf.mxu1  ;;  %v1923_v20 = vrot.slane %v1886_v1, 4 }
 0x161   :  { %v1706_v57 = vadd.f32 %v2841_v26, %v1581_v25  ;;  %v1360_v58 = vpop.f32.mrf.mxu0  ;;  %v1785_v60 = vrot.slane %v1784_v41, 1  ;;  %v1919_v28 = vsel %vm1918_vm4, %v1917_v49, %v2855_v34 }
 0x162   :  { %v1585_v61 = vpop.f32.mrf.mxu1 }
 0x163   :  { %v1788_v63 = vmax.f32 %v1787_v56, %v1706_v57  ;;  %v1586_v0 = vadd.f32 %v1585_v61, %v1360_v58  ;;  %v1362_v2 = vpop.f32.mrf.mxu0  ;;  %v1786_v9 = vmax.f32 %v1784_v41, %v1785_v60  ;;  %v1922_v56 = vsel %vm1921_vm5, %v1920_v37, %v1919_v28 }
 0x164   :  { %v1587_v4 = vpop.f32.mrf.mxu1  ;;  %v1925_v60 = vsel %vm1924_vm6, %v1923_v20, %v1922_v56 }
 0x165   :  { %v1789_v6 = vrot.slane %v1788_v63, 4  ;;  %v1363_v7 = vpop.f32.mrf.mxu0  ;;  %v1707_v15 = vadd.f32 %v2829_v53, %v1586_v0  ;;  %v1872_v29 = vadd.f32 %v2850_v52, %v1786_v9  ;;  %v1928_v62 = vsel %vm1927_vm7, %v1926_v11, %v1925_v60 }
 0x166   :  { %v1588_v10 = vpop.f32.mrf.mxu1 }
 0x167   :  { %v1790_v42 = vmax.f32 %v1788_v63, %v1789_v6  ;;  %v1589_v36 = vadd.f32 %v1588_v10, %v1363_v7  ;;  %v1365_v21 = vpop.f32.mrf.mxu0  ;;  %v1888_v54 = vmax.f32 %v1872_v29, 0.0 }
 0x168   :  { %v1590_v43 = vpop.f32.mrf.mxu1 }
 0x169   :  { %v1791_v23 = vrot.slane %v1790_v42, 2  ;;  %v1708_v44 = vadd.f32 %v2834_v55, %v1589_v36  ;;  %v1368_v45 = vpop.f32.mrf.mxu0  ;;  %v1929_v30 = vrot.slane %v1888_v54, 2 }
 0x16a   :  { %v1593_v13 = vpop.f32.mrf.mxu1 }
 0x16b   :  { %v1792_v22 = vmax.f32 %v1790_v42, %v1791_v23  ;;  %v1795_v17 = vmax.f32 %v1707_v15, %v1708_v44  ;;  %v1594_v33 = vadd.f32 %v1593_v13, %v1368_v45  ;;  %v1370_v14 = vpop.f32.mrf.mxu0  ;;  %v1931_v5 = vsel %vm1930_vm8, %v1929_v30, %v1928_v62 }
 0x16c   :  { %v1595_v48 = vpop.f32.mrf.mxu1 }
 0x16d   :  { %v1793_v50 = vrot.slane %v1792_v22, 1  ;;  %v1709_v51 = vadd.f32 %v2841_v26, %v1594_v33  ;;  %v1371_v38 = vpop.f32.mrf.mxu0 }
 0x16e   :  { %v1596_v39 = vpop.f32.mrf.mxu1 }
 0x16f   :  { %v1794_v19 = vmax.f32 %v1792_v22, %v1793_v50  ;;  %v1796_v40 = vmax.f32 %v1795_v17, %v1709_v51  ;;  %v1597_v12 = vadd.f32 %v1596_v39, %v1371_v38  ;;  %v1373_v24 = vpop.f32.mrf.mxu0 }
 0x170   :  { %v1598_v41 = vpop.f32.mrf.mxu1 }
 0x171   :  { %v1873_v25 = vadd.f32 %v2850_v52, %v1794_v19  ;;  %v1797_v31 = vrot.slane %v1796_v40, 4  ;;  %v1376_v27 = vpop.f32.mrf.mxu0  ;;  %v1710_v63 = vadd.f32 %v2829_v53, %v1597_v12 }
 0x172   :  { %v1601_v35 = vpop.f32.mrf.mxu1 }
 0x173   :  { %v1889_v57 = vmax.f32 %v1873_v25, 0.0  ;;  %v1602_v58 = vadd.f32 %v1601_v35, %v1376_v27  ;;  %v1378_v59 = vpop.f32.mrf.mxu0  ;;  %v1798_v34 = vmax.f32 %v1796_v40, %v1797_v31 }
 0x174   :  { %v1603_v61 = vpop.f32.mrf.mxu1 }
 0x175   :  { %v1711_v0 = vadd.f32 %v2834_v55, %v1602_v58  ;;  %v1379_v2 = vpop.f32.mrf.mxu0  ;;  %v1932_v3 = vrot.slane %v1889_v57, 1  ;;  %v1799_v16 = vrot.slane %v1798_v34, 2 }
 0x176   :  { %v1604_v4 = vpop.f32.mrf.mxu1 }
 0x177   :  { %v1803_v6 = vmax.f32 %v1710_v63, %v1711_v0  ;;  %v1605_v7 = vadd.f32 %v1604_v4, %v1379_v2  ;;  %v1381_v8 = vpop.f32.mrf.mxu0  ;;  %v1934_v9 = vsel %vm1933_vm9, %v1932_v3, %v1931_v5  ;;  %v1800_v23 = vmax.f32 %v1798_v34, %v1799_v16 }
 0x178   :  { %v1606_v10 = vpop.f32.mrf.mxu1  ;;  %1951 = vst [vmem:[#allocation2] sm:$0xff] %v1934_v9 }
 0x179   :  { %v1712_v42 = vadd.f32 %v2841_v26, %v1605_v7  ;;  %v1384_v36 = vpop.f32.mrf.mxu0  ;;  %v1801_v1 = vrot.slane %v1800_v23, 1 }
 0x17a   :  { %v1609_v21 = vpop.f32.mrf.mxu1 }
 0x17b   :  { %v1804_v32 = vmax.f32 %v1803_v6, %v1712_v42  ;;  %v1386_v43 = vpop.f32.mrf.mxu0  ;;  %v1802_v49 = vmax.f32 %v1800_v23, %v1801_v1  ;;  %v1610_v42 = vadd.f32 %v1609_v21, %v1384_v36 }
 0x17c   :  { %v1611_v18 = vpop.f32.mrf.mxu1 }
 0x17d   :  { %v1805_v15 = vrot.slane %v1804_v32, 4  ;;  %v1387_v44 = vpop.f32.mrf.mxu0  ;;  %v1874_v20 = vadd.f32 %v2850_v52, %v1802_v49 }
 0x17e   :  { %v1612_v45 = vpop.f32.mrf.mxu1 }
 0x17f   :  { %v1806_v46 = vmax.f32 %v1804_v32, %v1805_v15  ;;  %v1389_v29 = vpop.f32.mrf.mxu0  ;;  %v1890_v28 = vmax.f32 %v1874_v20, 0.0  ;;  %v1613_v8 = vadd.f32 %v1612_v45, %v1387_v44  ;;  %v1713_v45 = vadd.f32 %v2829_v53, %v1610_v42 }
 0x180   :  { %v1614_v13 = vpop.f32.mrf.mxu1 }
 0x181   :  { %v1807_v22 = vrot.slane %v1806_v46, 2  ;;  %v1392_v17 = vpop.f32.mrf.mxu0  ;;  %v1714_v13 = vadd.f32 %v2834_v55, %v1613_v8 }
 0x182   :  { %v1617_v33 = vpop.f32.mrf.mxu1 }
 0x183   :  { %v1808_v14 = vmax.f32 %v1806_v46, %v1807_v22  ;;  %v1394_v47 = vpop.f32.mrf.mxu0  ;;  %v1618_v32 = vadd.f32 %v1617_v33, %v1392_v17 }
 0x184   :  { %v1619_v48 = vpop.f32.mrf.mxu1 }
 0x185   :  { %v1809_v50 = vrot.slane %v1808_v14, 1  ;;  %v1395_v51 = vpop.f32.mrf.mxu0  ;;  %v1715_v36 = vadd.f32 %v2841_v26, %v1618_v32 }
 0x186   :  { %v1620_v38 = vpop.f32.mrf.mxu1 }
 0x187   :  { %v1810_v37 = vmax.f32 %v1808_v14, %v1809_v50  ;;  %v1397_v54 = vpop.f32.mrf.mxu0  ;;  %v1621_v23 = vadd.f32 %v1620_v38, %v1395_v51 }
 0x188   :  { %v1622_v39 = vpop.f32.mrf.mxu1 }
 0x189   :  { %v1875_v19 = vadd.f32 %v2850_v52, %v1810_v37  ;;  %v1400_v40 = vpop.f32.mrf.mxu0  ;;  %v1716_v33 = vadd.f32 %v2829_v53, %v1621_v23  ;;  %v1811_v37 = vmax.f32 %v1713_v45, %v1714_v13 }
 0x18a   :  { %v1625_v12 = vpop.f32.mrf.mxu1 }
 0x18b   :  { %v1891_v24 = vmax.f32 %v1875_v19, 0.0  ;;  %v1402_v11 = vpop.f32.mrf.mxu0  ;;  %v1626_v10 = vadd.f32 %v1625_v12, %v1400_v40 }
 0x18c   :  { %v1627_v41 = vpop.f32.mrf.mxu1  ;;  %v1812_v11 = vmax.f32 %v1811_v37, %v1715_v36 }
 0x18d   :  { %v1935_v25 = vrot.slane %v1891_v24, 7  ;;  %v1403_v31 = vpop.f32.mrf.mxu0  ;;  %v1717_v47 = vadd.f32 %v2834_v55, %v1626_v10 }
 0x18e   :  { %v1628_v27 = vpop.f32.mrf.mxu1 }
 0x18f   :  { %v2897_v30 = vsel %vm1915_vm3, %v1935_v25, %v1890_v28  ;;  %v1405_v35 = vpop.f32.mrf.mxu0  ;;  %v1629_v15 = vadd.f32 %v1628_v27, %v1403_v31  ;;  %v1819_v19 = vmax.f32 %v1716_v33, %v1717_v47 }
 0x190   :  { %v1630_v56 = vpop.f32.mrf.mxu1 }
 0x191   :  { %v1408_v57 = vpop.f32.mrf.mxu0  ;;  %v1718_v49 = vadd.f32 %v2841_v26, %v1629_v15 }
 0x192   :  { %v1633_v58 = vpop.f32.mrf.mxu1 }
 0x193   :  { %v1410_v59 = vpop.f32.mrf.mxu0  ;;  %v1634_v1 = vadd.f32 %v1633_v58, %v1408_v57  ;;  %v1820_v25 = vmax.f32 %v1819_v19, %v1718_v49 }
 0x194   :  { %v1635_v60 = vpop.f32.mrf.mxu1  ;;  %v1813_v59 = vrot.slane %v1812_v11, 4 }
 0x195   :  { %v1411_v61 = vpop.f32.mrf.mxu0  ;;  %v1719_v54 = vadd.f32 %v2829_v53, %v1634_v1 }
 0x196   :  { %v1636_v62 = vpop.f32.mrf.mxu1 }
 0x197   :  { %v1413_v34 = vpop.f32.mrf.mxu0  ;;  %v1637_v43 = vadd.f32 %v1636_v62, %v1411_v61  ;;  %v1821_v61 = vrot.slane %v1820_v25, 4 }
 0x198   :  { %v1638_v63 = vpop.f32.mrf.mxu1 }
 0x199   :  { %v1416_v0 = vpop.f32.mrf.mxu0  ;;  %v1720_v21 = vadd.f32 %v2834_v55, %v1637_v43  ;;  %v1822_v8 = vmax.f32 %v1820_v25, %v1821_v61 }
 0x19a   :  { %v1641_v2 = vpop.f32.mrf.mxu1 }
 0x19b   :  { %v1418_v3 = vpop.f32.mrf.mxu0  ;;  %v1642_v22 = vadd.f32 %v1641_v2, %v1416_v0  ;;  %v1827_v41 = vmax.f32 %v1719_v54, %v1720_v21  ;;  %v1823_v13 = vrot.slane %v1822_v8, 2 }
 0x19c   :  { %v1643_v4 = vpop.f32.mrf.mxu1 }
 0x19d   :  { %v1419_v5 = vpop.f32.mrf.mxu0  ;;  %v1721_v39 = vadd.f32 %v2841_v26, %v1642_v22 }
 0x19e   :  { %v1644_v6 = vpop.f32.mrf.mxu1 }
 0x19f   :  { %v1421_v7 = vpop.f32.mrf.mxu0  ;;  %v1645_v48 = vadd.f32 %v1644_v6, %v1419_v5  ;;  %v1828_v35 = vmax.f32 %v1827_v41, %v1721_v39  ;;  %v1814_v6 = vmax.f32 %v1812_v11, %v1813_v59 }
 0x1a0   :  { %v1646_v9 = vpop.f32.mrf.mxu1 }
 0x1a1   :  { %v1424_v16 = vpop.f32.mrf.mxu0  ;;  %v1722_v40 = vadd.f32 %v2829_v53, %v1645_v48  ;;  %v1829_v0 = vrot.slane %v1828_v35, 4 }
 0x1a2   :  { %v1649_v18 = vpop.f32.mrf.mxu1 }
 0x1a3   :  { %v1650_v46 = vadd.f32 %v1649_v18, %v1424_v16  ;;  %v1426_v29 = vpop.f32.mrf.mxu0  ;;  %v1830_v42 = vmax.f32 %v1828_v35, %v1829_v0 }
 0x1a4   :  { %v1651_v14 = vpop.f32.mrf.mxu1 }
 0x1a5   :  { %v1427_v44 = vpop.f32.mrf.mxu0  ;;  %v1723_v50 = vadd.f32 %v2834_v55, %v1650_v46  ;;  %v1815_v46 = vrot.slane %v1814_v6, 2  ;;  %v1831_v14 = vrot.slane %v1830_v42, 2 }
 0x1a6   :  { %v1652_v17 = vpop.f32.mrf.mxu1 }
 0x1a7   :  { %v1653_v51 = vadd.f32 %v1652_v17, %v1427_v44  ;;  %v1429_v38 = vpop.f32.mrf.mxu0  ;;  %v1835_v31 = vmax.f32 %v1722_v40, %v1723_v50  ;;  %v1816_v36 = vmax.f32 %v1814_v6, %v1815_v46  ;;  %v1824_v17 = vmax.f32 %v1822_v8, %v1823_v13 }
 0x1a8   :  { %v1654_v20 = vpop.f32.mrf.mxu1  ;;  %v1832_v38 = vmax.f32 %v1830_v42, %v1831_v14 }
 0x1a9   :  { %v1724_v12 = vadd.f32 %v2841_v26, %v1653_v51  ;;  %v1432_v24 = vpop.f32.mrf.mxu0  ;;  %v1817_v40 = vrot.slane %v1816_v36, 1 }
 0x1aa   :  { %v1657_v28 = vpop.f32.mrf.mxu1 }
 0x1ab   :  { %v1434_v27 = vpop.f32.mrf.mxu0  ;;  %v1836_v57 = vmax.f32 %v1835_v31, %v1724_v12  ;;  %v1658_v62 = vadd.f32 %v1657_v28, %v1432_v24  ;;  %v1825_v24 = vrot.slane %v1824_v17, 1  ;;  %v1833_v31 = vrot.slane %v1832_v38, 1 }
 0x1ac   :  { %v1659_v56 = vpop.f32.mrf.mxu1 }
 0x1ad   :  { %v1435_v58 = vpop.f32.mrf.mxu0  ;;  %v1837_v3 = vrot.slane %v1836_v57, 4  ;;  %v1725_v9 = vadd.f32 %v2829_v53, %v1658_v62 }
 0x1ae   :  { %v1660_v60 = vpop.f32.mrf.mxu1 }
 0x1af   :  { %v1661_v34 = vadd.f32 %v1660_v60, %v1435_v58  ;;  %v1437_v63 = vpop.f32.mrf.mxu0  ;;  %v1838_v43 = vmax.f32 %v1836_v57, %v1837_v3  ;;  %v1818_v58 = vmax.f32 %v1816_v36, %v1817_v40  ;;  %v1826_v60 = vmax.f32 %v1824_v17, %v1825_v24 }
 0x1b0   :  { %v1662_v2 = vpop.f32.mrf.mxu1 }
 0x1b1   :  { %v1726_v4 = vadd.f32 %v2834_v55, %v1661_v34  ;;  %v1440_v5 = vpop.f32.mrf.mxu0  ;;  %v1839_v48 = vrot.slane %v1838_v43, 2  ;;  %v1876_v63 = vadd.f32 %v2850_v52, %v1818_v58 }
 0x1b2   :  { %v1665_v7 = vpop.f32.mrf.mxu1 }
 0x1b3   :  { %v1666_v10 = vadd.f32 %v1665_v7, %v1440_v5  ;;  %v1442_v16 = vpop.f32.mrf.mxu0  ;;  %v1843_v18 = vmax.f32 %v1725_v9, %v1726_v4  ;;  %v1840_v54 = vmax.f32 %v1838_v43, %v1839_v48  ;;  %v1892_v6 = vmax.f32 %v1876_v63, 0.0 }
 0x1b4   :  { %v1667_v32 = vpop.f32.mrf.mxu1 }
 0x1b5   :  { %v1727_v23 = vadd.f32 %v2841_v26, %v1666_v10  ;;  %v1443_v15 = vpop.f32.mrf.mxu0  ;;  %v1841_v35 = vrot.slane %v1840_v54, 1  ;;  %v1937_v42 = vrot.slane %v1892_v6, 6 }
 0x1b6   :  { %v1668_v29 = vpop.f32.mrf.mxu1 }
 0x1b7   :  { %v1844_v1 = vmax.f32 %v1843_v18, %v1727_v23  ;;  %v1445_v22 = vpop.f32.mrf.mxu0  ;;  %v1669_v49 = vadd.f32 %v1668_v29, %v1443_v15  ;;  %v1842_v62 = vmax.f32 %v1840_v54, %v1841_v35  ;;  %v1938_v29 = vsel %vm1918_vm4, %v1937_v42, %v2897_v30 }
 0x1b8   :  { %v1670_v47 = vpop.f32.mrf.mxu1 }
 0x1b9   :  { %v1845_v44 = vrot.slane %v1844_v1, 4  ;;  %v1448_v45 = vpop.f32.mrf.mxu0  ;;  %v1728_v41 = vadd.f32 %v2829_v53, %v1669_v49  ;;  %v1877_v53 = vadd.f32 %v2850_v52, %v1826_v60  ;;  %v1879_v4 = vadd.f32 %v2850_v52, %v1842_v62 }
 0x1ba   :  { %v1673_v21 = vpop.f32.mrf.mxu1 }
 0x1bb   :  { %v1846_v33 = vmax.f32 %v1844_v1, %v1845_v44  ;;  %v1674_v50 = vadd.f32 %v1673_v21, %v1448_v45  ;;  %v1450_v51 = vpop.f32.mrf.mxu0  ;;  %v1893_v7 = vmax.f32 %v1877_v53, 0.0  ;;  %v1895_v10 = vmax.f32 %v1879_v4, 0.0 }
 0x1bc   :  { %v1675_v37 = vpop.f32.mrf.mxu1 }
 0x1bd   :  { %v1847_v39 = vrot.slane %v1846_v33, 2  ;;  %v1729_v20 = vadd.f32 %v2834_v55, %v1674_v50  ;;  %v1451_v19 = vpop.f32.mrf.mxu0  ;;  %v1834_v55 = vmax.f32 %v1832_v38, %v1833_v31  ;;  %v1939_v43 = vrot.slane %v1893_v7, 5 }
 0x1be   :  { %v1676_v12 = vpop.f32.mrf.mxu1  ;;  %v1943_v15 = vrot.slane %v1895_v10, 3 }
 0x1bf   :  { %v1848_v11 = vmax.f32 %v1846_v33, %v1847_v39  ;;  %v1677_v28 = vadd.f32 %v1676_v12, %v1451_v19  ;;  %v1453_v25 = vpop.f32.mrf.mxu0  ;;  %v1851_v56 = vmax.f32 %v1728_v41, %v1729_v20  ;;  %v1878_v3 = vadd.f32 %v2850_v52, %v1834_v55 }
 0x1c0   :  { %v1678_v27 = vpop.f32.mrf.mxu1  ;;  %v1940_v22 = vsel %vm1921_vm5, %v1939_v43, %v1938_v29 }
 0x1c1   :  { %v1730_v57 = vadd.f32 %v2841_v26, %v1677_v28  ;;  %v1849_v59 = vrot.slane %v1848_v11, 1  ;;  %v1894_v9 = vmax.f32 %v1878_v3, 0.0 }
 0x1c3   :  { %v1852_v61 = vmax.f32 %v1851_v56, %v1730_v57  ;;  %v1850_v0 = vmax.f32 %v1848_v11, %v1849_v59  ;;  %v1941_v23 = vrot.slane %v1894_v9, 4 }
 0x1c5   :  { %v1853_v34 = vrot.slane %v1852_v61, 4  ;;  %v1880_v26 = vadd.f32 %v2850_v52, %v1850_v0  ;;  %v1942_v14 = vsel %vm1924_vm6, %v1941_v23, %v1940_v22 }
 0x1c6   :  { %v1944_v47 = vsel %vm1927_vm7, %v1943_v15, %v1942_v14 }
 0x1c7   :  { %v1854_v2 = vmax.f32 %v1852_v61, %v1853_v34  ;;  %v1896_v32 = vmax.f32 %v1880_v26, 0.0 }
 0x1c9   :  { %v1855_v5 = vrot.slane %v1854_v2, 2  ;;  %v1945_v13 = vrot.slane %v1896_v32, 2 }
 0x1cb   :  { %v1856_v8 = vmax.f32 %v1854_v2, %v1855_v5  ;;  %v1946_v44 = vsel %vm1930_vm8, %v1945_v13, %v1944_v47 }
 0x1cd   :  { %v1857_v16 = vrot.slane %v1856_v8, 1 }
 0x1cf   :  { %v1858_v18 = vmax.f32 %v1856_v8, %v1857_v16 }
 0x1d1   :  { %v1881_v46 = vadd.f32 %v2850_v52, %v1858_v18 }
 0x1d3   :  { %v1897_v1 = vmax.f32 %v1881_v46, 0.0 }
 0x1d5   :  { %v1947_v48 = vrot.slane %v1897_v1, 1 }
 0x1d7   :  { %v1948_v45 = vsel %vm1933_vm9, %v1947_v48, %v1946_v44 }
 0x1d8   :  { %1952 = vst [vmem:[#allocation2 + $0x8] sm:$0xff] %v1948_v45 }
 0x1d9   :  { %2169 = shalt.err (!%p2166_p4)
}
 0x1da   :  { %s2182_s13 = smov 128   ;;  %s2183_s14 = smov 8  }
 0x1db   :  { %1964 = dma.vmem_to_hbm [thread:$0]  %s1959_s11, 256, %s2937_s4, [#allocation3], %s2182_s13, %s2182_s13, %s2183_s14  }
 0x1dc   :  { %2178 = dma.done.wait [#allocation3], 256  }
 0x1dd   :  { %2179 = vsyncadd [#allocation3], 4294967040 }
 0x1de   :  { %1968 = vsyncpa [#allocation3], 1 }

</bundles_post_ra>
